<compile_context>
chip_gen: v6e
topology: v6e:2x2x1
jax: 0.10.0
libtpu: 0.0.40
codegen_flags: <defaults>
</compile_context>

<pallas_src>
import functools

import jax
import jax.numpy as jnp
import numpy as np
from jax import lax
from jax.experimental import pallas as pl
from jax.experimental.pallas import tpu as pltpu

HIDDEN = 32  # hidden width fixed by the module definition


def nca_kernel(x_ref, w1_ref, b1_ref, w2_ref, b2_ref, w3_ref, b3_ref, o_ref,
               *, H, W, Cp, steps):
    """One batch element: runs all `steps` NCA updates on the padded-flat state.

    x_ref / o_ref : (1, Cp, Np)   channel-major padded-flat state
    w1_ref        : (32, 9*Cp)    folded 3x3 conv weight, tap k = dy*3 + dx
    b1_ref, b2_ref: (32, 1)
    w2_ref        : (32, 32)      (out, in)
    w3_ref        : (Cp, 32)      (out, in), rows >= C are zero
    b3_ref        : (Cp, 1)       rows >= C are zero
    """
    Wp = W + 2
    base = Wp + 1                 # flat index of interior pixel (1, 1)
    M = H * Wp - 2                # contiguous span covering (1,1) .. (H, W)

    # --- hoisted (loaded / built once, reused every step) -----------------
    w1f = w1_ref[...]             # (32, 9*Cp)
    w2 = w2_ref[...]              # (32, 32)
    w3 = w3_ref[...]              # (Cp, 32)
    b1 = b1_ref[...]              # (32, 1)  broadcasts along lanes
    b2 = b2_ref[...]              # (32, 1)
    b3 = b3_ref[...]              # (Cp, 1)

    # Multiplicative mask: positions inside the span that are real pixels
    # (not left/right padding columns).  Built once outside the step loop.
    j = lax.broadcasted_iota(jnp.int32, (1, M), 1)
    col = (base + j) % Wp
    interior = ((col >= 1) & (col <= W)).astype(jnp.float32)       # (1, M)

    # Flat start offset of each of the 9 taps (dy, dx) relative to the state.
    # Tap index k = dy*3 + dx matches the folded weight layout; k == 4 is the
    # center tap, whose slice is exactly the residual window.
    starts = [(dy - 1) * Wp + (dx - 1) + base
              for dy in range(3) for dx in range(3)]

    # State lives in the (VMEM) output block for the whole step loop; the
    # single HBM writeback happens after the kernel body finishes.
    o_ref[...] = x_ref[...]

    def step(_, carry):
        xcur = o_ref[0]                                   # (Cp, Np)
        # Folded im2col: 9 lane-shifted views stacked along sublanes.  Each
        # piece is a whole number of 8-sublane tiles -> aligned concat.
        pieces = [xcur[:, s:s + M] for s in starts]       # 9 x (Cp, M)
        im2col = jnp.concatenate(pieces, axis=0)          # (9*Cp, M)

        h1 = jnp.maximum(
            jnp.dot(w1f, im2col, preferred_element_type=jnp.float32) + b1,
            0.0)                                          # (32, M)
        h2 = jnp.maximum(
            jnp.dot(w2, h1, preferred_element_type=jnp.float32) + b2,
            0.0)                                          # (32, M)
        y = jnp.tanh(
            jnp.dot(w3, h2, preferred_element_type=jnp.float32) + b3)  # (Cp, M)

        # Residual update; padding columns receive 0 so the zero border (and
        # the zero padded-channel rows, since w3/b3 pad rows are zero and
        # tanh(0) == 0) are preserved across steps, which keeps the
        # shifted-slice conv exact.  pieces[4] is the center-tap slice ==
        # the residual window, so no extra slice is needed.
        upd = pieces[4] + y * interior
        o_ref[0, :, base:base + M] = upd                  # span store in VMEM
        return carry

    if steps <= 8:
        for s in range(steps):        # small step counts: full unroll
            step(s, 0)
    else:                             # large step counts: bounded-size body
        lax.fori_loop(0, steps, step, 0)


def nca_pallas(x_nchw, w1, b1, w2, b2, w3, b3, steps):
    """x_nchw: (B, C, H, W) float32.  Returns (B, C, H, W)."""
    B, C, H, W = x_nchw.shape
    Hp, Wp = H + 2, W + 2
    Np = Hp * Wp
    Cp = max(8, ((C + 7) // 8) * 8)   # channels rounded up to a sublane tile
    M = H * Wp - 2

    # Glue: pad channels to Cp and spatial to (Hp, Wp); flatten spatial.
    # Layout stays channel-major (NCHW-ish), so no transpose is needed.
    xp = jnp.pad(x_nchw.astype(jnp.float32),
                 ((0, 0), (0, Cp - C), (1, 1), (1, 1)))
    xf = xp.reshape(B, Cp, Np)                        # (B, Cp, Np)

    # Fold the 3x3 conv weight: HWIO (3,3,C,32) -> (32, 9*Cp), tap k = dy*3+dx.
    w1t = jnp.transpose(w1, (3, 0, 1, 2)).reshape(HIDDEN, 9, C)
    w1f = jnp.pad(w1t, ((0, 0), (0, 0), (0, Cp - C))).reshape(HIDDEN, 9 * Cp)

    # 1x1 convs as (out, in) matrices; pad the output channels of the last
    # layer so the Cp-padded state rows stay exactly zero (tanh(0) == 0).
    w2k = jnp.transpose(w2)                                        # (32, 32)
    w3k = jnp.pad(jnp.transpose(w3), ((0, Cp - C), (0, 0)))        # (Cp, 32)
    b1k = b1.reshape(HIDDEN, 1)
    b2k = b2.reshape(HIDDEN, 1)
    b3k = jnp.pad(b3.reshape(C, 1), ((0, Cp - C), (0, 0)))         # (Cp, 1)

    # Advisory cost estimate so XLA schedules the pad/reshape glue around the
    # (tiny, overhead-dominated) kernel instead of serializing it.
    flops = int(B) * int(steps) * 2 * int(M) * (
        HIDDEN * 9 * Cp + HIDDEN * HIDDEN + Cp * HIDDEN)
    bytes_accessed = 4 * (2 * B * Cp * Np + w1f.size + w2k.size + w3k.size
                          + b1k.size + b2k.size + b3k.size)
    cost = pl.CostEstimate(flops=int(flops),
                           transcendentals=int(B * steps * M * Cp),
                           bytes_accessed=int(bytes_accessed))

    kern = functools.partial(nca_kernel, H=H, W=W, Cp=Cp, steps=steps)
    out = pl.pallas_call(
        kern,
        out_shape=jax.ShapeDtypeStruct((B, Cp, Np), jnp.float32),
        grid=(B,),
        in_specs=[
            pl.BlockSpec((1, Cp, Np), lambda b: (b, 0, 0)),
            pl.BlockSpec((HIDDEN, 9 * Cp), lambda b: (0, 0)),
            pl.BlockSpec((HIDDEN, 1), lambda b: (0, 0)),
            pl.BlockSpec((HIDDEN, HIDDEN), lambda b: (0, 0)),
            pl.BlockSpec((HIDDEN, 1), lambda b: (0, 0)),
            pl.BlockSpec((Cp, HIDDEN), lambda b: (0, 0)),
            pl.BlockSpec((Cp, 1), lambda b: (0, 0)),
        ],
        out_specs=pl.BlockSpec((1, Cp, Np), lambda b: (b, 0, 0)),
        compiler_params=pltpu.CompilerParams(
            dimension_semantics=("parallel",)),   # batch across TCs (v7x)
        cost_estimate=cost,
    )(xf, w1f, b1k, w2k, b2k, w3k, b3k)

    # Glue: unflatten, drop channel + spatial padding -> NCHW.
    out = out.reshape(B, Cp, Hp, Wp)[:, :C, 1:-1, 1:-1]
    return out


def nca_ref(x_nchw, w1, b1, w2, b2, w3, b3, steps):
    """Pure-JAX reference matching the PyTorch module semantics."""
    x = jnp.transpose(x_nchw, (0, 2, 3, 1))      # NHWC
    for _ in range(steps):
        h = lax.conv_general_dilated(
            x, w1, window_strides=(1, 1), padding="SAME",
            dimension_numbers=("NHWC", "HWIO", "NHWC"))
        h = jnp.maximum(h + b1[0], 0.0)
        h = jnp.maximum(jnp.einsum("bhwc,cf->bhwf", h, w2) + b2[0], 0.0)
        y = jnp.tanh(jnp.einsum("bhwc,cf->bhwf", h, w3) + b3[0])
        x = x + y
    return jnp.transpose(x, (0, 3, 1, 2))


if __name__ == "__main__":
    B, C, H, W = 2, 4, 16, 16
    STEPS = 4

    key = jax.random.PRNGKey(0)
    kx, k1, kb1, k2, kb2, k3, kb3 = jax.random.split(key, 7)

    # Deterministic synthetic parameters (shapes from the module __init__).
    x = jax.random.uniform(kx, (B, C, H, W), jnp.float32)              # like torch.rand
    w1 = 0.2 * jax.random.normal(k1, (3, 3, C, HIDDEN), jnp.float32)   # HWIO
    b1 = 0.05 * jax.random.normal(kb1, (1, HIDDEN), jnp.float32)
    w2 = 0.2 * jax.random.normal(k2, (HIDDEN, HIDDEN), jnp.float32)    # 1x1 conv == matmul
    b2 = 0.05 * jax.random.normal(kb2, (1, HIDDEN), jnp.float32)
    w3 = 0.2 * jax.random.normal(k3, (HIDDEN, C), jnp.float32)         # 1x1 conv == matmul
    b3 = 0.05 * jax.random.normal(kb3, (1, C), jnp.float32)

    out = jax.block_until_ready(
        nca_pallas(x, w1, b1, w2, b2, w3, b3, STEPS))
    ref = jax.block_until_ready(
        nca_ref(x, w1, b1, w2, b2, w3, b3, STEPS))

    assert out.shape == x.shape and out.dtype == jnp.float32
    np.testing.assert_allclose(np.asarray(out), np.asarray(ref),
                               atol=2e-3, rtol=2e-3)
    print("KERNEL_OK")
</pallas_src>

<mosaic_0001>
module attributes {stable_mosaic.version = 11 : i64} {
  func.func @nca_kernel(%arg0: i32, %arg1: memref<1x8x324xf32, #tpu.memory_space<vmem>>, %arg2: memref<32x72xf32, #tpu.memory_space<vmem>>, %arg3: memref<32x1xf32, #tpu.memory_space<vmem>>, %arg4: memref<32x32xf32, #tpu.memory_space<vmem>>, %arg5: memref<32x1xf32, #tpu.memory_space<vmem>>, %arg6: memref<8x32xf32, #tpu.memory_space<vmem>>, %arg7: memref<8x1xf32, #tpu.memory_space<vmem>>, %arg8: memref<1x8x324xf32, #tpu.memory_space<vmem>>) attributes {dimension_semantics = [#tpu.dimension_semantics<parallel>], iteration_bounds = array<i64: 2>, scalar_prefetch = 0 : i64, scratch_operands = 0 : i64, tpu.core_type = #tpu.core_type<tc>, window_params = [{transform_indices = @transform_0, window_bounds = array<i64: 1, 8, 324>}, {pipeline_mode = #tpu.pipeline_mode<synchronous>, transform_indices = @transform_1, window_bounds = array<i64: 32, 72>}, {pipeline_mode = #tpu.pipeline_mode<synchronous>, transform_indices = @transform_2, window_bounds = array<i64: 32, 1>}, {pipeline_mode = #tpu.pipeline_mode<synchronous>, transform_indices = @transform_3, window_bounds = array<i64: 32, 32>}, {pipeline_mode = #tpu.pipeline_mode<synchronous>, transform_indices = @transform_4, window_bounds = array<i64: 32, 1>}, {pipeline_mode = #tpu.pipeline_mode<synchronous>, transform_indices = @transform_5, window_bounds = array<i64: 8, 32>}, {pipeline_mode = #tpu.pipeline_mode<synchronous>, transform_indices = @transform_6, window_bounds = array<i64: 8, 1>}, {transform_indices = @transform_7, window_bounds = array<i64: 1, 8, 324>}]} {
    %c0 = arith.constant 0 : index
    %c0_0 = arith.constant 0 : index
    %0 = vector.load %arg2[%c0, %c0_0] : memref<32x72xf32, #tpu.memory_space<vmem>>, vector<32x72xf32>
    %c0_1 = arith.constant 0 : index
    %c0_2 = arith.constant 0 : index
    %1 = vector.load %arg4[%c0_1, %c0_2] : memref<32x32xf32, #tpu.memory_space<vmem>>, vector<32x32xf32>
    %c0_3 = arith.constant 0 : index
    %c0_4 = arith.constant 0 : index
    %2 = vector.load %arg6[%c0_3, %c0_4] : memref<8x32xf32, #tpu.memory_space<vmem>>, vector<8x32xf32>
    %c0_5 = arith.constant 0 : index
    %c0_6 = arith.constant 0 : index
    %3 = vector.load %arg3[%c0_5, %c0_6] : memref<32x1xf32, #tpu.memory_space<vmem>>, vector<32x1xf32>
    %c0_7 = arith.constant 0 : index
    %c0_8 = arith.constant 0 : index
    %4 = vector.load %arg5[%c0_7, %c0_8] : memref<32x1xf32, #tpu.memory_space<vmem>>, vector<32x1xf32>
    %c0_9 = arith.constant 0 : index
    %c0_10 = arith.constant 0 : index
    %5 = vector.load %arg7[%c0_9, %c0_10] : memref<8x1xf32, #tpu.memory_space<vmem>>, vector<8x1xf32>
    %6 = tpu.iota {dimensions = array<i32: 1>} : vector<1x286xi32>
    %c19_i32 = arith.constant 19 : i32
    %7 = vector.broadcast %c19_i32 : i32 to vector<1x286xi32>
    %8 = arith.addi %7, %6 : vector<1x286xi32>
    %c18_i32 = arith.constant 18 : i32
    %c0_i32 = arith.constant 0 : i32
    %9 = arith.cmpi eq, %c18_i32, %c0_i32 : i32
    %c1_i32 = arith.constant 1 : i32
    %10 = arith.select %9, %c1_i32, %c18_i32 : i32
    %11 = vector.broadcast %10 : i32 to vector<1x286xi32>
    %12 = arith.remsi %8, %11 : vector<1x286xi32>
    %c0_i32_11 = arith.constant 0 : i32
    %13 = vector.broadcast %c0_i32_11 : i32 to vector<1x286xi32>
    %14 = arith.cmpi ne, %12, %13 : vector<1x286xi32>
    %c0_i32_12 = arith.constant 0 : i32
    %15 = vector.broadcast %c0_i32_12 : i32 to vector<1x286xi32>
    %16 = arith.cmpi slt, %12, %15 : vector<1x286xi32>
    %c0_i32_13 = arith.constant 0 : i32
    %17 = arith.cmpi slt, %10, %c0_i32_13 : i32
    %18 = vector.broadcast %17 : i1 to vector<1x286xi1>
    %19 = vector.broadcast %18 : vector<1x286xi1> to vector<1x286xi1>
    %20 = arith.xori %16, %19 : vector<1x286xi1>
    %21 = arith.andi %20, %14 : vector<1x286xi1>
    %22 = vector.broadcast %10 : i32 to vector<1x286xi32>
    %23 = arith.addi %12, %22 : vector<1x286xi32>
    %24 = arith.select %21, %23, %12 : vector<1x286xi1>, vector<1x286xi32>
    %c1_i32_14 = arith.constant 1 : i32
    %25 = vector.broadcast %c1_i32_14 : i32 to vector<1x286xi32>
    %26 = arith.cmpi sge, %24, %25 : vector<1x286xi32>
    %c16_i32 = arith.constant 16 : i32
    %27 = vector.broadcast %c16_i32 : i32 to vector<1x286xi32>
    %28 = arith.cmpi sle, %24, %27 : vector<1x286xi32>
    %29 = arith.andi %26, %28 : vector<1x286xi1>
    %30 = arith.extui %29 : vector<1x286xi1> to vector<1x286xi32>
    %31 = arith.sitofp %30 : vector<1x286xi32> to vector<1x286xf32>
    %c0_15 = arith.constant 0 : index
    %c0_16 = arith.constant 0 : index
    %c0_17 = arith.constant 0 : index
    %32 = vector.load %arg1[%c0_15, %c0_16, %c0_17] : memref<1x8x324xf32, #tpu.memory_space<vmem>>, vector<1x8x324xf32>
    %c0_18 = arith.constant 0 : index
    %c0_19 = arith.constant 0 : index
    %c0_20 = arith.constant 0 : index
    %33 = vector.load %arg8[%c0_18, %c0_19, %c0_20] : memref<1x8x324xf32, #tpu.memory_space<vmem>>, vector<1x8x324xf32>
    tpu.vector_store %arg8[%c0_18, %c0_19, %c0_20], %32 {strides = array<i32>} : memref<1x8x324xf32, #tpu.memory_space<vmem>>, vector<1x8x324xf32>,
    %c0_21 = arith.constant 0 : index
    %c0_22 = arith.constant 0 : index
    %c0_23 = arith.constant 0 : index
    %34 = vector.load %arg8[%c0_21, %c0_22, %c0_23] : memref<1x8x324xf32, #tpu.memory_space<vmem>>, vector<1x8x324xf32>
    %35 = vector.shape_cast %34 : vector<1x8x324xf32> to vector<8x324xf32>
    %36 = vector.extract_strided_slice %35 {offsets = [0, 0], sizes = [8, 286], strides = [1, 1]} : vector<8x324xf32> to vector<8x286xf32>
    %37 = vector.extract_strided_slice %35 {offsets = [0, 1], sizes = [8, 286], strides = [1, 1]} : vector<8x324xf32> to vector<8x286xf32>
    %38 = vector.extract_strided_slice %35 {offsets = [0, 2], sizes = [8, 286], strides = [1, 1]} : vector<8x324xf32> to vector<8x286xf32>
    %39 = vector.extract_strided_slice %35 {offsets = [0, 18], sizes = [8, 286], strides = [1, 1]} : vector<8x324xf32> to vector<8x286xf32>
    %40 = vector.extract_strided_slice %35 {offsets = [0, 19], sizes = [8, 286], strides = [1, 1]} : vector<8x324xf32> to vector<8x286xf32>
    %41 = vector.extract_strided_slice %35 {offsets = [0, 20], sizes = [8, 286], strides = [1, 1]} : vector<8x324xf32> to vector<8x286xf32>
    %42 = vector.extract_strided_slice %35 {offsets = [0, 36], sizes = [8, 286], strides = [1, 1]} : vector<8x324xf32> to vector<8x286xf32>
    %43 = vector.extract_strided_slice %35 {offsets = [0, 37], sizes = [8, 286], strides = [1, 1]} : vector<8x324xf32> to vector<8x286xf32>
    %44 = vector.extract_strided_slice %35 {offsets = [0, 38], sizes = [8, 286], strides = [1, 1]} : vector<8x324xf32> to vector<8x286xf32>
    %45 = tpu.concatenate %36, %37, %38, %39, %40, %41, %42, %43, %44 in 0 : vector<8x286xf32>, vector<8x286xf32>, vector<8x286xf32>, vector<8x286xf32>, vector<8x286xf32>, vector<8x286xf32>, vector<8x286xf32>, vector<8x286xf32>, vector<8x286xf32> -> vector<72x286xf32>
    %cst = arith.constant dense<0.000000e+00> : vector<32x286xf32>
    %46 = tpu.matmul %0, %45, %cst {dimension_numbers = #tpu.dot_dimension_numbers<[1], [0], [0], [1], [0, 0, 1, 1], [], []>} : vector<32x72xf32>, vector<72x286xf32>, vector<32x286xf32> -> vector<32x286xf32>
    %47 = vector.broadcast %3 : vector<32x1xf32> to vector<32x286xf32>
    %48 = arith.addf %46, %47 : vector<32x286xf32>
    %cst_24 = arith.constant 0.000000e+00 : f32
    %49 = vector.broadcast %cst_24 : f32 to vector<32x286xf32>
    %50 = arith.maximumf %48, %49 : vector<32x286xf32>
    %cst_25 = arith.constant dense<0.000000e+00> : vector<32x286xf32>
    %51 = tpu.matmul %1, %50, %cst_25 {dimension_numbers = #tpu.dot_dimension_numbers<[1], [0], [0], [1], [0, 0, 1, 1], [], []>} : vector<32x32xf32>, vector<32x286xf32>, vector<32x286xf32> -> vector<32x286xf32>
    %52 = vector.broadcast %4 : vector<32x1xf32> to vector<32x286xf32>
    %53 = arith.addf %51, %52 : vector<32x286xf32>
    %cst_26 = arith.constant 0.000000e+00 : f32
    %54 = vector.broadcast %cst_26 : f32 to vector<32x286xf32>
    %55 = arith.maximumf %53, %54 : vector<32x286xf32>
    %cst_27 = arith.constant dense<0.000000e+00> : vector<8x286xf32>
    %56 = tpu.matmul %2, %55, %cst_27 {dimension_numbers = #tpu.dot_dimension_numbers<[1], [0], [0], [1], [0, 0, 1, 1], [], []>} : vector<8x32xf32>, vector<32x286xf32>, vector<8x286xf32> -> vector<8x286xf32>
    %57 = vector.broadcast %5 : vector<8x1xf32> to vector<8x286xf32>
    %58 = arith.addf %56, %57 : vector<8x286xf32>
    %59 = math.tanh %58 : vector<8x286xf32>
    %60 = vector.broadcast %31 : vector<1x286xf32> to vector<8x286xf32>
    %61 = arith.mulf %59, %60 : vector<8x286xf32>
    %62 = arith.addf %40, %61 : vector<8x286xf32>
    %c0_28 = arith.constant 0 : index
    %c0_29 = arith.constant 0 : index
    %c19 = arith.constant 19 : index
    %63 = vector.load %arg8[%c0_28, %c0_29, %c19] : memref<1x8x324xf32, #tpu.memory_space<vmem>>, vector<1x8x286xf32>
    %64 = vector.shape_cast %63 : vector<1x8x286xf32> to vector<8x286xf32>
    %65 = vector.shape_cast %62 : vector<8x286xf32> to vector<1x8x286xf32>
    tpu.vector_store %arg8[%c0_28, %c0_29, %c19], %65 {strides = array<i32>} : memref<1x8x324xf32, #tpu.memory_space<vmem>>, vector<1x8x286xf32>,
    %c0_30 = arith.constant 0 : index
    %c0_31 = arith.constant 0 : index
    %c0_32 = arith.constant 0 : index
    %66 = vector.load %arg8[%c0_30, %c0_31, %c0_32] : memref<1x8x324xf32, #tpu.memory_space<vmem>>, vector<1x8x324xf32>
    %67 = vector.shape_cast %66 : vector<1x8x324xf32> to vector<8x324xf32>
    %68 = vector.extract_strided_slice %67 {offsets = [0, 0], sizes = [8, 286], strides = [1, 1]} : vector<8x324xf32> to vector<8x286xf32>
    %69 = vector.extract_strided_slice %67 {offsets = [0, 1], sizes = [8, 286], strides = [1, 1]} : vector<8x324xf32> to vector<8x286xf32>
    %70 = vector.extract_strided_slice %67 {offsets = [0, 2], sizes = [8, 286], strides = [1, 1]} : vector<8x324xf32> to vector<8x286xf32>
    %71 = vector.extract_strided_slice %67 {offsets = [0, 18], sizes = [8, 286], strides = [1, 1]} : vector<8x324xf32> to vector<8x286xf32>
    %72 = vector.extract_strided_slice %67 {offsets = [0, 19], sizes = [8, 286], strides = [1, 1]} : vector<8x324xf32> to vector<8x286xf32>
    %73 = vector.extract_strided_slice %67 {offsets = [0, 20], sizes = [8, 286], strides = [1, 1]} : vector<8x324xf32> to vector<8x286xf32>
    %74 = vector.extract_strided_slice %67 {offsets = [0, 36], sizes = [8, 286], strides = [1, 1]} : vector<8x324xf32> to vector<8x286xf32>
    %75 = vector.extract_strided_slice %67 {offsets = [0, 37], sizes = [8, 286], strides = [1, 1]} : vector<8x324xf32> to vector<8x286xf32>
    %76 = vector.extract_strided_slice %67 {offsets = [0, 38], sizes = [8, 286], strides = [1, 1]} : vector<8x324xf32> to vector<8x286xf32>
    %77 = tpu.concatenate %68, %69, %70, %71, %72, %73, %74, %75, %76 in 0 : vector<8x286xf32>, vector<8x286xf32>, vector<8x286xf32>, vector<8x286xf32>, vector<8x286xf32>, vector<8x286xf32>, vector<8x286xf32>, vector<8x286xf32>, vector<8x286xf32> -> vector<72x286xf32>
    %cst_33 = arith.constant dense<0.000000e+00> : vector<32x286xf32>
    %78 = tpu.matmul %0, %77, %cst_33 {dimension_numbers = #tpu.dot_dimension_numbers<[1], [0], [0], [1], [0, 0, 1, 1], [], []>} : vector<32x72xf32>, vector<72x286xf32>, vector<32x286xf32> -> vector<32x286xf32>
    %79 = vector.broadcast %3 : vector<32x1xf32> to vector<32x286xf32>
    %80 = arith.addf %78, %79 : vector<32x286xf32>
    %cst_34 = arith.constant 0.000000e+00 : f32
    %81 = vector.broadcast %cst_34 : f32 to vector<32x286xf32>
    %82 = arith.maximumf %80, %81 : vector<32x286xf32>
    %cst_35 = arith.constant dense<0.000000e+00> : vector<32x286xf32>
    %83 = tpu.matmul %1, %82, %cst_35 {dimension_numbers = #tpu.dot_dimension_numbers<[1], [0], [0], [1], [0, 0, 1, 1], [], []>} : vector<32x32xf32>, vector<32x286xf32>, vector<32x286xf32> -> vector<32x286xf32>
    %84 = vector.broadcast %4 : vector<32x1xf32> to vector<32x286xf32>
    %85 = arith.addf %83, %84 : vector<32x286xf32>
    %cst_36 = arith.constant 0.000000e+00 : f32
    %86 = vector.broadcast %cst_36 : f32 to vector<32x286xf32>
    %87 = arith.maximumf %85, %86 : vector<32x286xf32>
    %cst_37 = arith.constant dense<0.000000e+00> : vector<8x286xf32>
    %88 = tpu.matmul %2, %87, %cst_37 {dimension_numbers = #tpu.dot_dimension_numbers<[1], [0], [0], [1], [0, 0, 1, 1], [], []>} : vector<8x32xf32>, vector<32x286xf32>, vector<8x286xf32> -> vector<8x286xf32>
    %89 = vector.broadcast %5 : vector<8x1xf32> to vector<8x286xf32>
    %90 = arith.addf %88, %89 : vector<8x286xf32>
    %91 = math.tanh %90 : vector<8x286xf32>
    %92 = vector.broadcast %31 : vector<1x286xf32> to vector<8x286xf32>
    %93 = arith.mulf %91, %92 : vector<8x286xf32>
    %94 = arith.addf %72, %93 : vector<8x286xf32>
    %c0_38 = arith.constant 0 : index
    %c0_39 = arith.constant 0 : index
    %c19_40 = arith.constant 19 : index
    %95 = vector.load %arg8[%c0_38, %c0_39, %c19_40] : memref<1x8x324xf32, #tpu.memory_space<vmem>>, vector<1x8x286xf32>
    %96 = vector.shape_cast %95 : vector<1x8x286xf32> to vector<8x286xf32>
    %97 = vector.shape_cast %94 : vector<8x286xf32> to vector<1x8x286xf32>
    tpu.vector_store %arg8[%c0_38, %c0_39, %c19_40], %97 {strides = array<i32>} : memref<1x8x324xf32, #tpu.memory_space<vmem>>, vector<1x8x286xf32>,
    %c0_41 = arith.constant 0 : index
    %c0_42 = arith.constant 0 : index
    %c0_43 = arith.constant 0 : index
    %98 = vector.load %arg8[%c0_41, %c0_42, %c0_43] : memref<1x8x324xf32, #tpu.memory_space<vmem>>, vector<1x8x324xf32>
    %99 = vector.shape_cast %98 : vector<1x8x324xf32> to vector<8x324xf32>
    %100 = vector.extract_strided_slice %99 {offsets = [0, 0], sizes = [8, 286], strides = [1, 1]} : vector<8x324xf32> to vector<8x286xf32>
    %101 = vector.extract_strided_slice %99 {offsets = [0, 1], sizes = [8, 286], strides = [1, 1]} : vector<8x324xf32> to vector<8x286xf32>
    %102 = vector.extract_strided_slice %99 {offsets = [0, 2], sizes = [8, 286], strides = [1, 1]} : vector<8x324xf32> to vector<8x286xf32>
    %103 = vector.extract_strided_slice %99 {offsets = [0, 18], sizes = [8, 286], strides = [1, 1]} : vector<8x324xf32> to vector<8x286xf32>
    %104 = vector.extract_strided_slice %99 {offsets = [0, 19], sizes = [8, 286], strides = [1, 1]} : vector<8x324xf32> to vector<8x286xf32>
    %105 = vector.extract_strided_slice %99 {offsets = [0, 20], sizes = [8, 286], strides = [1, 1]} : vector<8x324xf32> to vector<8x286xf32>
    %106 = vector.extract_strided_slice %99 {offsets = [0, 36], sizes = [8, 286], strides = [1, 1]} : vector<8x324xf32> to vector<8x286xf32>
    %107 = vector.extract_strided_slice %99 {offsets = [0, 37], sizes = [8, 286], strides = [1, 1]} : vector<8x324xf32> to vector<8x286xf32>
    %108 = vector.extract_strided_slice %99 {offsets = [0, 38], sizes = [8, 286], strides = [1, 1]} : vector<8x324xf32> to vector<8x286xf32>
    %109 = tpu.concatenate %100, %101, %102, %103, %104, %105, %106, %107, %108 in 0 : vector<8x286xf32>, vector<8x286xf32>, vector<8x286xf32>, vector<8x286xf32>, vector<8x286xf32>, vector<8x286xf32>, vector<8x286xf32>, vector<8x286xf32>, vector<8x286xf32> -> vector<72x286xf32>
    %cst_44 = arith.constant dense<0.000000e+00> : vector<32x286xf32>
    %110 = tpu.matmul %0, %109, %cst_44 {dimension_numbers = #tpu.dot_dimension_numbers<[1], [0], [0], [1], [0, 0, 1, 1], [], []>} : vector<32x72xf32>, vector<72x286xf32>, vector<32x286xf32> -> vector<32x286xf32>
    %111 = vector.broadcast %3 : vector<32x1xf32> to vector<32x286xf32>
    %112 = arith.addf %110, %111 : vector<32x286xf32>
    %cst_45 = arith.constant 0.000000e+00 : f32
    %113 = vector.broadcast %cst_45 : f32 to vector<32x286xf32>
    %114 = arith.maximumf %112, %113 : vector<32x286xf32>
    %cst_46 = arith.constant dense<0.000000e+00> : vector<32x286xf32>
    %115 = tpu.matmul %1, %114, %cst_46 {dimension_numbers = #tpu.dot_dimension_numbers<[1], [0], [0], [1], [0, 0, 1, 1], [], []>} : vector<32x32xf32>, vector<32x286xf32>, vector<32x286xf32> -> vector<32x286xf32>
    %116 = vector.broadcast %4 : vector<32x1xf32> to vector<32x286xf32>
    %117 = arith.addf %115, %116 : vector<32x286xf32>
    %cst_47 = arith.constant 0.000000e+00 : f32
    %118 = vector.broadcast %cst_47 : f32 to vector<32x286xf32>
    %119 = arith.maximumf %117, %118 : vector<32x286xf32>
    %cst_48 = arith.constant dense<0.000000e+00> : vector<8x286xf32>
    %120 = tpu.matmul %2, %119, %cst_48 {dimension_numbers = #tpu.dot_dimension_numbers<[1], [0], [0], [1], [0, 0, 1, 1], [], []>} : vector<8x32xf32>, vector<32x286xf32>, vector<8x286xf32> -> vector<8x286xf32>
    %121 = vector.broadcast %5 : vector<8x1xf32> to vector<8x286xf32>
    %122 = arith.addf %120, %121 : vector<8x286xf32>
    %123 = math.tanh %122 : vector<8x286xf32>
    %124 = vector.broadcast %31 : vector<1x286xf32> to vector<8x286xf32>
    %125 = arith.mulf %123, %124 : vector<8x286xf32>
    %126 = arith.addf %104, %125 : vector<8x286xf32>
    %c0_49 = arith.constant 0 : index
    %c0_50 = arith.constant 0 : index
    %c19_51 = arith.constant 19 : index
    %127 = vector.load %arg8[%c0_49, %c0_50, %c19_51] : memref<1x8x324xf32, #tpu.memory_space<vmem>>, vector<1x8x286xf32>
    %128 = vector.shape_cast %127 : vector<1x8x286xf32> to vector<8x286xf32>
    %129 = vector.shape_cast %126 : vector<8x286xf32> to vector<1x8x286xf32>
    tpu.vector_store %arg8[%c0_49, %c0_50, %c19_51], %129 {strides = array<i32>} : memref<1x8x324xf32, #tpu.memory_space<vmem>>, vector<1x8x286xf32>,
    %c0_52 = arith.constant 0 : index
    %c0_53 = arith.constant 0 : index
    %c0_54 = arith.constant 0 : index
    %130 = vector.load %arg8[%c0_52, %c0_53, %c0_54] : memref<1x8x324xf32, #tpu.memory_space<vmem>>, vector<1x8x324xf32>
    %131 = vector.shape_cast %130 : vector<1x8x324xf32> to vector<8x324xf32>
    %132 = vector.extract_strided_slice %131 {offsets = [0, 0], sizes = [8, 286], strides = [1, 1]} : vector<8x324xf32> to vector<8x286xf32>
    %133 = vector.extract_strided_slice %131 {offsets = [0, 1], sizes = [8, 286], strides = [1, 1]} : vector<8x324xf32> to vector<8x286xf32>
    %134 = vector.extract_strided_slice %131 {offsets = [0, 2], sizes = [8, 286], strides = [1, 1]} : vector<8x324xf32> to vector<8x286xf32>
    %135 = vector.extract_strided_slice %131 {offsets = [0, 18], sizes = [8, 286], strides = [1, 1]} : vector<8x324xf32> to vector<8x286xf32>
    %136 = vector.extract_strided_slice %131 {offsets = [0, 19], sizes = [8, 286], strides = [1, 1]} : vector<8x324xf32> to vector<8x286xf32>
    %137 = vector.extract_strided_slice %131 {offsets = [0, 20], sizes = [8, 286], strides = [1, 1]} : vector<8x324xf32> to vector<8x286xf32>
    %138 = vector.extract_strided_slice %131 {offsets = [0, 36], sizes = [8, 286], strides = [1, 1]} : vector<8x324xf32> to vector<8x286xf32>
    %139 = vector.extract_strided_slice %131 {offsets = [0, 37], sizes = [8, 286], strides = [1, 1]} : vector<8x324xf32> to vector<8x286xf32>
    %140 = vector.extract_strided_slice %131 {offsets = [0, 38], sizes = [8, 286], strides = [1, 1]} : vector<8x324xf32> to vector<8x286xf32>
    %141 = tpu.concatenate %132, %133, %134, %135, %136, %137, %138, %139, %140 in 0 : vector<8x286xf32>, vector<8x286xf32>, vector<8x286xf32>, vector<8x286xf32>, vector<8x286xf32>, vector<8x286xf32>, vector<8x286xf32>, vector<8x286xf32>, vector<8x286xf32> -> vector<72x286xf32>
    %cst_55 = arith.constant dense<0.000000e+00> : vector<32x286xf32>
    %142 = tpu.matmul %0, %141, %cst_55 {dimension_numbers = #tpu.dot_dimension_numbers<[1], [0], [0], [1], [0, 0, 1, 1], [], []>} : vector<32x72xf32>, vector<72x286xf32>, vector<32x286xf32> -> vector<32x286xf32>
    %143 = vector.broadcast %3 : vector<32x1xf32> to vector<32x286xf32>
    %144 = arith.addf %142, %143 : vector<32x286xf32>
    %cst_56 = arith.constant 0.000000e+00 : f32
    %145 = vector.broadcast %cst_56 : f32 to vector<32x286xf32>
    %146 = arith.maximumf %144, %145 : vector<32x286xf32>
    %cst_57 = arith.constant dense<0.000000e+00> : vector<32x286xf32>
    %147 = tpu.matmul %1, %146, %cst_57 {dimension_numbers = #tpu.dot_dimension_numbers<[1], [0], [0], [1], [0, 0, 1, 1], [], []>} : vector<32x32xf32>, vector<32x286xf32>, vector<32x286xf32> -> vector<32x286xf32>
    %148 = vector.broadcast %4 : vector<32x1xf32> to vector<32x286xf32>
    %149 = arith.addf %147, %148 : vector<32x286xf32>
    %cst_58 = arith.constant 0.000000e+00 : f32
    %150 = vector.broadcast %cst_58 : f32 to vector<32x286xf32>
    %151 = arith.maximumf %149, %150 : vector<32x286xf32>
    %cst_59 = arith.constant dense<0.000000e+00> : vector<8x286xf32>
    %152 = tpu.matmul %2, %151, %cst_59 {dimension_numbers = #tpu.dot_dimension_numbers<[1], [0], [0], [1], [0, 0, 1, 1], [], []>} : vector<8x32xf32>, vector<32x286xf32>, vector<8x286xf32> -> vector<8x286xf32>
    %153 = vector.broadcast %5 : vector<8x1xf32> to vector<8x286xf32>
    %154 = arith.addf %152, %153 : vector<8x286xf32>
    %155 = math.tanh %154 : vector<8x286xf32>
    %156 = vector.broadcast %31 : vector<1x286xf32> to vector<8x286xf32>
    %157 = arith.mulf %155, %156 : vector<8x286xf32>
    %158 = arith.addf %136, %157 : vector<8x286xf32>
    %c0_60 = arith.constant 0 : index
    %c0_61 = arith.constant 0 : index
    %c19_62 = arith.constant 19 : index
    %159 = vector.load %arg8[%c0_60, %c0_61, %c19_62] : memref<1x8x324xf32, #tpu.memory_space<vmem>>, vector<1x8x286xf32>
    %160 = vector.shape_cast %159 : vector<1x8x286xf32> to vector<8x286xf32>
    %161 = vector.shape_cast %158 : vector<8x286xf32> to vector<1x8x286xf32>
    tpu.vector_store %arg8[%c0_60, %c0_61, %c19_62], %161 {strides = array<i32>} : memref<1x8x324xf32, #tpu.memory_space<vmem>>, vector<1x8x286xf32>,
    return
  }
  func.func @transform_0(%arg0: i32) -> (i32, i32, i32) {
    %c0_i32 = arith.constant 0 : i32
    %c0_i32_0 = arith.constant 0 : i32
    %c0_i32_1 = arith.constant 0 : i32
    return %arg0, %c0_i32, %c0_i32_0 : i32, i32, i32
  }
  func.func @transform_1(%arg0: i32) -> (i32, i32) {
    %c0_i32 = arith.constant 0 : i32
    %c0_i32_0 = arith.constant 0 : i32
    %c0_i32_1 = arith.constant 0 : i32
    return %c0_i32, %c0_i32_0 : i32, i32
  }
  func.func @transform_2(%arg0: i32) -> (i32, i32) {
    %c0_i32 = arith.constant 0 : i32
    %c0_i32_0 = arith.constant 0 : i32
    %c0_i32_1 = arith.constant 0 : i32
    return %c0_i32, %c0_i32_0 : i32, i32
  }
  func.func @transform_3(%arg0: i32) -> (i32, i32) {
    %c0_i32 = arith.constant 0 : i32
    %c0_i32_0 = arith.constant 0 : i32
    %c0_i32_1 = arith.constant 0 : i32
    return %c0_i32, %c0_i32_0 : i32, i32
  }
  func.func @transform_4(%arg0: i32) -> (i32, i32) {
    %c0_i32 = arith.constant 0 : i32
    %c0_i32_0 = arith.constant 0 : i32
    %c0_i32_1 = arith.constant 0 : i32
    return %c0_i32, %c0_i32_0 : i32, i32
  }
  func.func @transform_5(%arg0: i32) -> (i32, i32) {
    %c0_i32 = arith.constant 0 : i32
    %c0_i32_0 = arith.constant 0 : i32
    %c0_i32_1 = arith.constant 0 : i32
    return %c0_i32, %c0_i32_0 : i32, i32
  }
  func.func @transform_6(%arg0: i32) -> (i32, i32) {
    %c0_i32 = arith.constant 0 : i32
    %c0_i32_0 = arith.constant 0 : i32
    %c0_i32_1 = arith.constant 0 : i32
    return %c0_i32, %c0_i32_0 : i32, i32
  }
  func.func @transform_7(%arg0: i32) -> (i32, i32, i32) {
    %c0_i32 = arith.constant 0 : i32
    %c0_i32_0 = arith.constant 0 : i32
    %c0_i32_1 = arith.constant 0 : i32
    return %arg0, %c0_i32, %c0_i32_0 : i32, i32, i32
  }
}

</mosaic_0001>

<bundles_post_ra>
// kernel: tpu_custom_call.1
= control target key start
LH: loop header
LB: loop body
LE: loop exit
PB: predicated region body
PF: predicated region fallthrough
CT: control target
= control target key end

     0   :  { %12 = vsyncpa [#allocation3], 0  ;;  %s4737_s0 = inlined_call_operand.vmem [shape: f32[2,8,324], index: 0, kind: input, shape index: {}]   ;;  %s4738_s1 = inlined_call_operand.hbm [shape: f32[32,72], index: 1, kind: input, shape index: {}]   ;;  %s4739_s2 = inlined_call_operand.vmem [shape: f32[32,1], index: 2, kind: input, shape index: {}]   ;;  %s4740_s3 = inlined_call_operand.vmem [shape: f32[32,32], index: 3, kind: input, shape index: {}]   ;;  %s4741_s4 = inlined_call_operand.vmem [shape: f32[32,1], index: 4, kind: input, shape index: {}]   ;;  %s4742_s5 = inlined_call_operand.hbm [shape: f32[8,32], index: 5, kind: input, shape index: {}]   ;;  %s4743_s6 = inlined_call_operand.vmem [shape: f32[8,1], index: 6, kind: input, shape index: {}]   ;;  %s4744_s7 = inlined_call_operand.hbm [shape: f32[2,8,324], index: 7, kind: output, shape index: {}]  }
   0x1   :  { %13 = vsyncpa [#allocation6], 0 }
   0x2   :  { %14 = vsyncpa [#allocation4], 0 }
   0x3   :  { %16 = vsyncpa [#allocation4 + $0x1], 0  ;;  %s3797_s24 = smov 0   ;;  %s3799_s25 = smov 0  }
   0x4   :  { %s3801_s26 = smov 0   ;;  %s3803_s27 = smov 0  }
   0x5 LB: > { %s3818_s28 = sadd.s32 4294967295, %s3738_s27   ;;  %s3113_s29 = sadd.s32 4294967294, %s3738_s27   ;;  %s3738_s27 = sphi %s3803_s27, %s4887_s27   ;;  %s3734_s26 = sphi %s3801_s26, %s4886_s26   ;;  %s3730_s25 = sphi %s3799_s25, %s4885_s25   ;;  %s3726_s24 = sphi %s3797_s24, %s4884_s24  }
   0x6   : > { %s3822_s30 = sadd.s32 1, %s3738_s27   ;;  %s181_s8 = sadd.s32 1, %s3734_s26 }
   0x7   : > { %s178_s9 = ssub.s32 %s3738_s27, %s3822_s30  ;;  %p191_p0 = scmp.ne.s32.totalorder %s3734_s26, %s3730_s25 }
   0x8   : > { %p179_p1 = scmp.eq.s32.totalorder %s178_s9, 0  ;;  %p192_p2 = scmp.eq.s32.totalorder %s3818_s28, 1 }
   0x9   : > { %p197_p3 = scmp.ne.s32.totalorder %s3730_s25, %s3726_s24  ;;  %p198_p4 = scmp.eq.s32.totalorder %s3113_s29, 1 }
   0xa   : > { %s3833_s10 = scalar_select %p179_p1, %s3734_s26, %s181_s8  }
   0xb   : > { %p3835_p5 = por %p192_p2, %p191_p0  ;;  %p3839_p6 = por %p198_p4, %p197_p3 }
   0xc   : > { %p3114_p7 = scmp.ge.s32.totalorder %s3738_s27, 1  ;;  %p205_p8 = scmp.lt.s32.totalorder %s3738_s27, 3 }
   0xd   : > { %s4770_s12 = scalar_select %p3839_p6, 1, 0 }
   0xe   : > { %p4745_p9 = scmp.eq.s32.totalorder %s3818_s28, 0  ;;  %p3846_p10 = pnand %p3114_p7, %p205_p8 }
   0xf   : > { %s3740_s14 = smov [#allocation2]   ;;  %s3741_s17 = smov [#allocation5]  }
  0x10   : > { %s217_s15 = sshll.u32 %s3740_s14, 4  ;;  %p3519_p11 = pneg %p3846_p10  ;;  %s218_s15 = int_to_ptr.vmem [resolvable:$true] %s217_s15 }
  0x11   : > { %s240_s18 = sshll.u32 %s3741_s17, 4  ;;  %s3629_s19 = scalar_lea.vmem %s218_s15, 512  ;;  %s241_s18 = int_to_ptr.vmem [resolvable:$true] %s240_s18 }
  0x12   : > { %p3854_p12 = pnand %p4745_p9, %p3519_p11  ;;  %p3630_p0 = scmp.ne.s32.totalorder %s218_s15, %s3629_s19 }
  0x13   : > { %p3637_p3 = scmp.lt.s32.totalorder %s218_s15, %s218_s15  ;;  %p3638_p4 = scmp.lt.s32.totalorder %s3629_s19, %s3629_s19 }
  0x14   : > { %p3620_p13 = pneg %p3854_p12 }
  0x15   : > { %p3639_p7 = por %p3638_p4, %p3637_p3 }
  0x16   : > { %p3632_p1 = pnand %p3630_p0, %p3620_p13 }
  0x18   : > { %p3633_p2 = pneg %p3632_p1 }
  0x1a   : > { %p3640_p8 = pnand %p3639_p7, %p3633_p2 }
  0x1c   : > { %3643 = shalt.err (!%p3640_p8)
}
  0x1d   : > { %s3742_s20 = smov 128   ;;  %s3743_s21 = smov 8  }
  0x1e   : > { %3522 = dma.hbm_to_vmem [thread:$0]  (!%p3854_p12), %s4738_s1, 512, %s218_s15, [#allocation3], %s3742_s20, %s3742_s20, %s3743_s21  }
  0x1f   : > { %s3655_s29 = scalar_lea.vmem %s241_s18, 128  ;;  %p3663_p9 = scmp.lt.s32.totalorder %s241_s18, %s241_s18 }
  0x20   : > { %p3656_p11 = scmp.ne.s32.totalorder %s241_s18, %s3655_s29  ;;  %p3664_p6 = scmp.lt.s32.totalorder %s3655_s29, %s3655_s29 }
  0x22   : > { %p3658_p0 = pnand %p3656_p11, %p3620_p13  ;;  %p3665_p3 = por %p3664_p6, %p3663_p9 }
  0x24   : > { %p3659_p1 = pneg %p3658_p0 }
  0x26   : > { %p3666_p2 = pnand %p3665_p3, %p3659_p1 }
  0x28   : > { %3669 = shalt.err (!%p3666_p2)
}
  0x29   : > { %3525 = dma.hbm_to_vmem [thread:$0]  (!%p3854_p12), %s4742_s5, 128, %s241_s18, [#allocation6]  }
  0x2a   : > { %264 = sbr.rel (%p3846_p10) target bundleno = 3825 (0xef1), region = 48  ;;  %p4773_p4 = scmp.eq.s32.totalorder (!%p3846_p10), %s3818_s28, 0 }
  0x2f   : > { %3713 = dma.done.wait (%p4773_p4), [#allocation3], 512   ;;  %p4774_p13 = pmov %p4773_p4 }
  0x30   : > { %p4775_p7 = pmov %p4773_p4 }
  0x31   : > { %3715 = vsyncadd (%p4774_p13), [#allocation3], 4294966784 }
  0x32   : > { %3717 = dma.done.wait (%p4775_p7), [#allocation6], 128   ;;  %p4776_p6 = pmov %p4773_p4 }
  0x33   : > { %s4746_s14 = sand.u32 1, %s3730_s25   ;;  %p300_p9 = scmp.lt.s32.totalorder %s3818_s28, 1  ;;  %vm398_vm0 = vcmask 556032   ;;  %v3944_v4 = vld [vmem:[#allocation2] sm:$0xff]  ;;  %vm4760_vm1 = vcmask 588800   ;;  %v3751_v5 = vmov 0.0  }
  0x34   : > { %3719 = vsyncadd (%p4776_p6), [#allocation6], 4294967168  ;;  %s3500_s13 = smul.u32 24, %s4746_s14  ;;  %s3744_s20 = smov 90   ;;  %3322 = vmatprep.mubr.msk.f32.mxu1 %vm4760_vm1, %v3944_v4  ;;  %599 = vmatprep.mubr.f32.mxu0 %v3751_v5  ;;  %v317_v6 = vld [vmem:[%s4739_s2 + $0x18] sm:$0xff]  ;;  %v316_v7 = vld [vmem:[%s4739_s2 + $0x10] sm:$0xff] }
  0x35   : > { %s301_s15 = scalar_select %p300_p9, %s3818_s28, 1  ;;  %v3753_v8 = vmov 0   ;;  %v314_v9 = vld [vmem:[%s4739_s2] sm:$0xff]  ;;  %v315_v10 = vld [vmem:[%s4739_s2 + $0x8] sm:$0xff]  ;;  %v321_v11 = vld [vmem:[%s4741_s4 + $0x18] sm:$0xff]  ;;  %vm4768_vm2 = vcmask 736256  }
  0x36   : > { %s3900_s21 = scalar_lea.vmem [#allocation7], %s3500_s13  ;;  %s3745_s22 = smov 91   ;;  %3583 = vset.pattern.permute.xlu0 %v3753_v8  ;;  %3584 = vset.pattern.permute.xlu1 %v3753_v8  ;;  %v320_v12 = vld [vmem:[%s4741_s4 + $0x10] sm:$0xff]  ;;  %v319_v13 = vld [vmem:[%s4741_s4 + $0x8] sm:$0xff]  ;;  %v318_v14 = vld [vmem:[%s4741_s4] sm:$0xff]  ;;  %vm4767_vm3 = vcmask 744448  }
  0x37   : > { %s3501_s16 = smul.u32 24, %s301_s15  ;;  %s4755_s23 = smov 92   ;;  %v322_v15 = vld [vmem:[%s4743_s6] sm:$0xff]  ;;  %vm4766_vm4 = vcmask 752640   ;;  %vm4765_vm5 = vcmask 883712   ;;  %vm4764_vm6 = vcmask 891904  }
  0x38   : > { %s3747_s29 = smov 108   ;;  %s4749_s8 = smov 109   ;;  %vm4763_vm7 = vcmask 900096   ;;  %vm4762_vm8 = vcmask 1031168   ;;  %vm4761_vm9 = vcmask 1039360   ;;  %v4002_v56 = vld [vmem:[#allocation2 + $0x8] sm:$0xff] }
  0x39   : > { %s304_s19 = scalar_lea.vmem %s4737_s0, %s3501_s16  ;;  %s4751_s9 = smov 110   ;;  %v4005_v57 = vld [vmem:[#allocation2 + $0x10] sm:$0xff]  ;;  %v4016_v58 = vld [vmem:[#allocation2 + $0x18] sm:$0xff]  ;;  %v4033_v59 = vld [vmem:[%s4740_s3] sm:$0xff]  ;;  %vm4759_vm10 = vcmask 261120   ;;  %vm4757_vm11 = vmmov 0  }
  0x3a   : > { %v3894_v0 = vld [vmem:[%s304_s19 + $0x8] sm:$0xff]  ;;  %v395_v1 = vld [vmem:[%s304_s19 + $0x10] sm:$0xff]  ;;  %v3896_v2 = vld [vmem:[%s304_s19] sm:$0xff]  ;;  %s4747_s13 = smov 126   ;;  %s4753_s15 = smov 127  }
  0x3b   : > { %492 = vrot.lane.b32.xlu0 %v3894_v0, %s3744_s20  ;;  %396 = vst [vmem:[%s3900_s21] sm:$0xff] %v3896_v2  ;;  %490 = vrot.lane.b32.xlu1 %v3896_v2, %s3744_s20  ;;  %399 = vst.msk [vmem:[%s3900_s21 + $0x10] sm:$0xff] %vm398_vm0, %v395_v1  ;;  %s4780_s16 = smov 126   ;;  %s4781_s17 = smov 127  }
  0x3f   : > { %480 = vrot.lane.b32.xlu1 %v3894_v0, %s3745_s22 }
  0x42   : > { %v3910_v3 = vld [vmem:[%s3900_s21 + $0x10] sm:$0xff] }
  0x43   : > { %494 = vrot.lane.b32.xlu0 %v3910_v3, %s3744_s20  ;;  %478 = vrot.lane.b32.xlu1 %v3896_v2, %s3745_s22 }
  0x47   : > { %482 = vrot.lane.b32.xlu0 %v3910_v3, %s3745_s22  ;;  %470 = vrot.lane.b32.xlu1 %v3910_v3, %s4755_s23 }
  0x4b   : > { %468 = vrot.lane.b32.xlu0 %v3894_v0, %s4755_s23  ;;  %456 = vrot.lane.b32.xlu1 %v3894_v0, %s3747_s29 }
  0x4f   : > { %466 = vrot.lane.b32.xlu0 %v3896_v2, %s4755_s23  ;;  %454 = vrot.lane.b32.xlu1 %v3896_v2, %s3747_s29  ;;  %s4778_s23 = smov 110  }
  0x53   : > { %458 = vrot.lane.b32.xlu0 %v3910_v3, %s3747_s29  ;;  %446 = vrot.lane.b32.xlu1 %v3910_v3, %s4749_s8 }
  0x57   : > { %444 = vrot.lane.b32.xlu0 %v3894_v0, %s4749_s8  ;;  %432 = vrot.lane.b32.xlu1 %v3894_v0, %s4751_s9 }
  0x5b   : > { %442 = vrot.lane.b32.xlu0 %v3896_v2, %s4749_s8  ;;  %430 = vrot.lane.b32.xlu1 %v3896_v2, %s4751_s9  ;;  %s3755_s8 = smov 19  }
  0x5f   : > { %434 = vrot.lane.b32.xlu0 %v3910_v3, %s4751_s9  ;;  %422 = vrot.lane.b32.xlu1 %v3910_v3, %s4747_s13  ;;  %s4777_s9 = smov 92  }
  0x63   : > { %420 = vrot.lane.b32.xlu0 %v3894_v0, %s4747_s13  ;;  %408 = vrot.lane.b32.xlu1 %v3894_v0, %s4753_s15 }
  0x67   : > { %418 = vrot.lane.b32.xlu0 %v3896_v2, %s4747_s13  ;;  %406 = vrot.lane.b32.xlu1 %v3896_v2, %s4753_s15 }
  0x6b   : > { %410 = vrot.lane.b32.xlu0 %v3910_v3, %s4753_s15  ;;  %514 = vperm.xlu1 %3584, %v316_v7   ;;  %s4779_s15 = smov 109  }
  0x6f   : > { %519 = vperm.xlu0 %3583, %v317_v6   ;;  %509 = vperm.xlu1 %3584, %v315_v10  }
  0x73   : > { %504 = vperm.xlu0 %3583, %v314_v9   ;;  %738 = vperm.xlu1 %3584, %v321_v11  }
  0x77   : > { %733 = vperm.xlu0 %3583, %v320_v12   ;;  %728 = vperm.xlu1 %3584, %v319_v13  }
  0x7b   : > { %723 = vperm.xlu0 %3583, %v318_v14   ;;  %942 = vperm.xlu1 %3584, %v322_v15  }
  0xad   : > { %v491_v16 = vpop.permute.xlu1 %490  ;;  %v493_v17 = vpop.permute.xlu0 %492 }
  0xae   : > { %v497_v22 = vsel %vm4768_vm2, %v491_v16, %v493_v17 }
  0xb1   : > { %v481_v18 = vpop.permute.xlu1 %480 }
  0xb5   : > { %v495_v19 = vpop.permute.xlu0 %494  ;;  %v479_v20 = vpop.permute.xlu1 %478 }
  0xb6   : > { %3304 = vmatprep.subr.mxu1 %v495_v19  ;;  %v498_v21 = vsel %vm4768_vm2, %v493_v17, %v495_v19  ;;  %v485_v26 = vsel %vm4767_vm3, %v479_v20, %v481_v18 }
  0xb7   : > { %549 = vmatprep.subr.mxu0 %v498_v21  ;;  %3305 = vmatpush3.msra.mxu1 %v495_v19 }
  0xb8   : > { %550 = vmatpush1.msra.mxu0 %v497_v22 }
  0xb9   : > { %v483_v23 = vpop.permute.xlu0 %482  ;;  %v471_v24 = vpop.permute.xlu1 %470 }
  0xba   : > { %3306 = vmatprep.subr.mxu1 %v483_v23  ;;  %v486_v25 = vsel %vm4767_vm3, %v481_v18, %v483_v23 }
  0xbb   : > { %551 = vmatprep.subr.mxu0 %v486_v25  ;;  %3307 = vmatpush3.msra.mxu1 %v483_v23 }
  0xbc   : > { %552 = vmatpush1.msra.mxu0 %v485_v26  ;;  %3308 = vmatprep.subr.mxu1 %v471_v24 }
  0xbd   : > { %v469_v27 = vpop.permute.xlu0 %468  ;;  %3309 = vmatpush3.msra.mxu1 %v471_v24  ;;  %v457_v28 = vpop.permute.xlu1 %456 }
  0xbe   : > { %v474_v29 = vsel %vm4766_vm4, %v469_v27, %v471_v24  ;;  %v4052_v24 = vld [vmem:[%s4740_s3 + $0x8] sm:$0xff] }
  0xbf   : > { %553 = vmatprep.subr.mxu0 %v474_v29 }
  0xc1   : > { %v467_v30 = vpop.permute.xlu0 %466  ;;  %v455_v31 = vpop.permute.xlu1 %454 }
  0xc2   : > { %v473_v32 = vsel %vm4766_vm4, %v467_v30, %v469_v27  ;;  %v461_v36 = vsel %vm4765_vm5, %v455_v31, %v457_v28  ;;  %v4058_v27 = vld [vmem:[%s4740_s3 + $0x10] sm:$0xff] }
  0xc3   : > { %554 = vmatpush1.msra.mxu0 %v473_v32 }
  0xc5   : > { %v459_v33 = vpop.permute.xlu0 %458  ;;  %v447_v34 = vpop.permute.xlu1 %446 }
  0xc6   : > { %3310 = vmatprep.subr.mxu1 %v459_v33  ;;  %v462_v35 = vsel %vm4765_vm5, %v457_v28, %v459_v33 }
  0xc7   : > { %555 = vmatprep.subr.mxu0 %v462_v35  ;;  %3311 = vmatpush3.msra.mxu1 %v459_v33  ;;  %v4071_v33 = vld [vmem:[%s4740_s3 + $0x18] sm:$0xff] }
  0xc8   : > { %556 = vmatpush1.msra.mxu0 %v461_v36  ;;  %3312 = vmatprep.subr.mxu1 %v447_v34 }
  0xc9   : > { %v445_v37 = vpop.permute.xlu0 %444  ;;  %3313 = vmatpush3.msra.mxu1 %v447_v34  ;;  %v433_v38 = vpop.permute.xlu1 %432 }
  0xca   : > { %v450_v39 = vsel %vm4764_vm6, %v445_v37, %v447_v34 }
  0xcb   : > { %557 = vmatprep.subr.mxu0 %v450_v39 }
  0xcd   : > { %v443_v40 = vpop.permute.xlu0 %442  ;;  %v431_v41 = vpop.permute.xlu1 %430 }
  0xce   : > { %v449_v42 = vsel %vm4764_vm6, %v443_v40, %v445_v37  ;;  %v437_v46 = vsel %vm4763_vm7, %v431_v41, %v433_v38 }
  0xcf   : > { %558 = vmatpush1.msra.mxu0 %v449_v42 }
  0xd1   : > { %v435_v43 = vpop.permute.xlu0 %434  ;;  %v423_v44 = vpop.permute.xlu1 %422 }
  0xd2   : > { %3314 = vmatprep.subr.mxu1 %v435_v43  ;;  %v438_v45 = vsel %vm4763_vm7, %v433_v38, %v435_v43 }
  0xd3   : > { %559 = vmatprep.subr.mxu0 %v438_v45  ;;  %3315 = vmatpush3.msra.mxu1 %v435_v43 }
  0xd4   : > { %560 = vmatpush1.msra.mxu0 %v437_v46  ;;  %3316 = vmatprep.subr.mxu1 %v423_v44 }
  0xd5   : > { %v421_v47 = vpop.permute.xlu0 %420  ;;  %3317 = vmatpush3.msra.mxu1 %v423_v44  ;;  %v409_v49 = vpop.permute.xlu1 %408 }
  0xd6   : > { %v426_v48 = vsel %vm4762_vm8, %v421_v47, %v423_v44 }
  0xd7   : > { %561 = vmatprep.subr.mxu0 %v426_v48 }
  0xd9   : > { %v419_v50 = vpop.permute.xlu0 %418  ;;  %v407_v52 = vpop.permute.xlu1 %406 }
  0xda   : > { %v425_v51 = vsel %vm4762_vm8, %v419_v50, %v421_v47  ;;  %v413_v55 = vsel %vm4761_vm9, %v407_v52, %v409_v49 }
  0xdb   : > { %562 = vmatpush1.msra.mxu0 %v425_v51 }
  0xdd   : > { %v411_v53 = vpop.permute.xlu0 %410 }
  0xde   : > { %3318 = vmatprep.subr.mxu1 %v411_v53  ;;  %v414_v54 = vsel %vm4761_vm9, %v409_v49, %v411_v53 }
  0xdf   : > { %563 = vmatprep.subr.mxu0 %v414_v54  ;;  %3319 = vmatpush3.msra.mxu1 %v411_v53 }
  0xe0   : > { %564 = vmatpush1.msra.mxu0 %v413_v55  ;;  %3320 = vmatprep.subr.mxu1 %v3910_v3 }
  0xe1   : > { %565 = vmatprep.subr.mxu0 %v3894_v0  ;;  %3321 = vmatpush3.msra.mxu1 %v3910_v3 }
  0xe2   : > { %566 = vmatpush1.msra.mxu0 %v3896_v2  ;;  %3323 = vmatmul.mubr.msk.f32.vlgmr.msra.gmra.mxu1 %vm4760_vm1, %v4002_v56 }
  0xe3   : > { %3125 = vmatmul.mubr.msk.f32.vlgmr.msra.gmra.mxu0 %vm4760_vm1, %v3944_v4  ;;  %3325 = vmatprep.mubr.msk.f32.mxu1 %vm4760_vm1, %v4005_v57 }
  0xe4   : > { %605 = vmatprep.mubr.f32.mxu0 %v3751_v5 }
  0xe6   : > { %3326 = vmatmul.mubr.msk.f32.gmra.mxu1 %vm4760_vm1, %v4016_v58  ;;  %v4037_v60 = vpop.permute.xlu1 %514 }
  0xe7   : > { %3126 = vmatmul.mubr.msk.f32.gmra.mxu0 %vm4760_vm1, %v4002_v56  ;;  %818 = vmatprep.mubr.f32.mxu1 %v3751_v5 }
  0xe8   : > { %611 = vmatprep.mubr.f32.mxu0 %v3751_v5 }
  0xea   : > { %v4039_v61 = vpop.permute.xlu0 %519  ;;  %v4041_v7 = vpop.permute.xlu1 %509 }
  0xeb   : > { %3127 = vmatmul.mubr.msk.f32.gmra.mxu0 %vm4760_vm1, %v4005_v57 }
  0xec   : > { %617 = vmatprep.mubr.f32.mxu0 %v3751_v5 }
  0xee   : > { %v4045_v12 = vpop.permute.xlu0 %504  ;;  %v4093_v44 = vpop.permute.xlu1 %738 }
  0xef   : > { %3128 = vmatmul.mubr.msk.f32.gmra.mxu0 %vm4760_vm1, %v4016_v58 }
  0xf0   : > { %3336 = vmatprep.mubr.msk.f32.mxu0 %vm4759_vm10, %v4033_v59 }
  0xf2   : > { %v4095_v46 = vpop.permute.xlu0 %733  ;;  %v4098_v50 = vpop.permute.xlu1 %728 }
  0xf6   : > { %v4102_v55 = vpop.permute.xlu0 %723 }
 0x1a2   : > { %v3324_v62 = vpop.f32.mrf.mxu1 }
 0x1a3   : > { %v601_v63 = vpop.f32.mrf.mxu0  ;;  %v696_v11 = vadd.f32 %v3324_v62, %v4041_v7 }
 0x1a4   : > { %v690_v1 = vpop.f32.mrf.mxu1  ;;  %v602_v38 = vadd.f32 %v601_v63, %v4045_v12 }
 0x1a5   : > { %v603_v6 = vpop.f32.mrf.mxu0  ;;  %v691_v14 = vadd.f32 %v690_v1, %v4045_v12  ;;  %v714_v20 = vmax.f32 %v696_v11, 0.0 }
 0x1a6   : > { %v3327_v8 = vpop.f32.mrf.mxu1  ;;  %v604_v36 = vadd.f32 %v603_v6, %v4045_v12  ;;  %v709_v43 = vmax.f32 %v602_v38, 0.0 }
 0x1a7   : > { %v706_v9 = vadd.f32 %v3327_v8, %v4039_v61  ;;  %v607_v10 = vpop.f32.mrf.mxu0  ;;  %v711_v21 = vmax.f32 %v691_v14, 0.0 }
 0x1a8   : > { %v700_v13 = vpop.f32.mrf.mxu1  ;;  %v608_v34 = vadd.f32 %v607_v10, %v4041_v7  ;;  %v710_v42 = vmax.f32 %v604_v36, 0.0  ;;  %v4107_v10 = vld [vmem:[#allocation5] sm:$0xff] }
 0x1a9   : > { %v720_v15 = vmax.f32 %v706_v9, 0.0  ;;  %v701_v16 = vadd.f32 %v700_v13, %v4037_v60  ;;  %v609_v17 = vpop.f32.mrf.mxu0 }
 0x1aa   : > { %v610_v31 = vadd.f32 %v609_v17, %v4041_v7  ;;  %v712_v41 = vmax.f32 %v608_v34, 0.0 }
 0x1ab   : > { %v717_v18 = vmax.f32 %v701_v16, 0.0  ;;  %v613_v19 = vpop.f32.mrf.mxu0  ;;  %3328 = vmatprep.subr.mxu0 %v720_v15 }
 0x1ac   : > { %3329 = vmatpush3.msra.mxu0 %v720_v15  ;;  %v614_v30 = vadd.f32 %v613_v19, %v4037_v60  ;;  %v713_v40 = vmax.f32 %v610_v31, 0.0 }
 0x1ad   : > { %v615_v22 = vpop.f32.mrf.mxu0  ;;  %3330 = vmatprep.subr.mxu0 %v717_v18 }
 0x1ae   : > { %3331 = vmatpush3.msra.mxu0 %v717_v18  ;;  %v616_v28 = vadd.f32 %v615_v22, %v4037_v60  ;;  %v715_v39 = vmax.f32 %v614_v30, 0.0 }
 0x1af   : > { %v619_v23 = vpop.f32.mrf.mxu0  ;;  %3332 = vmatprep.subr.mxu0 %v714_v20 }
 0x1b0   : > { %3333 = vmatpush3.msra.mxu0 %v714_v20  ;;  %v620_v25 = vadd.f32 %v619_v23, %v4039_v61  ;;  %v716_v37 = vmax.f32 %v616_v28, 0.0 }
 0x1b1   : > { %v621_v26 = vpop.f32.mrf.mxu0  ;;  %3334 = vmatprep.subr.mxu0 %v711_v21 }
 0x1b2   : > { %v622_v29 = vadd.f32 %v621_v26, %v4039_v61  ;;  %3335 = vmatpush3.msra.mxu0 %v711_v21  ;;  %v718_v35 = vmax.f32 %v620_v25, 0.0 }
 0x1b3   : > { %3337 = vmatmul.mubr.msk.f32.vlgmr.msra.gmra.mxu0 %vm4759_vm10, %v4052_v24 }
 0x1b4   : > { %v719_v32 = vmax.f32 %v622_v29, 0.0  ;;  %3339 = vmatprep.mubr.msk.f32.mxu0 %vm4759_vm10, %v4058_v27 }
 0x1b6   : > { %778 = vmatprep.subr.mxu1 %v719_v32 }
 0x1b7   : > { %779 = vmatpush1.msra.mxu1 %v718_v35  ;;  %3340 = vmatmul.mubr.msk.f32.gmra.mxu0 %vm4759_vm10, %v4071_v33 }
 0x1b8   : > { %780 = vmatprep.subr.mxu1 %v716_v37  ;;  %1012 = vmatprep.mubr.f32.mxu0 %v3751_v5  ;;  %v323_v37 = vlaneseq }
 0x1b9   : > { %781 = vmatpush1.msra.mxu1 %v715_v39 }
 0x1ba   : > { %782 = vmatprep.subr.mxu1 %v713_v40  ;;  %v324_v38 = vand.u32 127, %v323_v37 }
 0x1bb   : > { %783 = vmatpush1.msra.mxu1 %v712_v41 }
 0x1bc   : > { %784 = vmatprep.subr.mxu1 %v710_v42  ;;  %v325_v39 = vadd.s32 128, %v324_v38  ;;  %v326_v40 = vadd.s32 256, %v324_v38  ;;  %v327_v41 = vadd.s32 19, %v324_v38 }
 0x1bd   : > { %785 = vmatpush1.msra.mxu1 %v709_v43 }
 0x1be   : > { %3133 = vmatmul.mubr.msk.f32.vlgmr.msra.gmra.mxu1 %vm4759_vm10, %v4033_v59  ;;  %3342 = vmatprep.subr.mxu1 %v3751_v5  ;;  %v328_v42 = vadd.s32 19, %v325_v39 }
 0x1bf   : > { %824 = vmatprep.mubr.f32.mxu1 %v3751_v5 }
 0x1c2   : > { %3134 = vmatmul.mubr.msk.f32.gmra.mxu1 %vm4759_vm10, %v4052_v24 }
 0x1c3   : > { %830 = vmatprep.mubr.f32.mxu1 %v3751_v5 }
 0x1c6   : > { %3135 = vmatmul.mubr.msk.f32.gmra.mxu1 %vm4759_vm10, %v4058_v27 }
 0x1c7   : > { %836 = vmatprep.mubr.f32.mxu1 %v3751_v5 }
 0x1ca   : > { %3136 = vmatmul.mubr.msk.f32.gmra.mxu1 %vm4759_vm10, %v4071_v33 }
 0x1cb   : > { %3350 = vmatprep.mubr.msk.f32.mxu1 %vm4757_vm11, %v3751_v5 }
 0x273   : > { %v3338_v45 = vpop.f32.mrf.mxu0 }
 0x274   : > { %v915_v52 = vadd.f32 %v3338_v45, %v4098_v50  ;;  %v329_v45 = vadd.s32 19, %v326_v40 }
 0x275   : > { %v909_v47 = vpop.f32.mrf.mxu0 }
 0x276   : > { %v910_v62 = vadd.f32 %v909_v47, %v4102_v55  ;;  %v933_v1 = vmax.f32 %v915_v52, 0.0 }
 0x277   : > { %v3341_v48 = vpop.f32.mrf.mxu0 }
 0x278   : > { %v925_v49 = vadd.f32 %v3341_v48, %v4093_v44  ;;  %v930_v8 = vmax.f32 %v910_v62, 0.0  ;;  %v4125_v47 = vmul.u32.u64.low 3817748708, %v327_v41  ;;  %v4126_v48 = vmul.u32.u64.high 3817748708, %v327_v41, %v4125_v47 }
 0x279   : > { %v919_v51 = vpop.f32.mrf.mxu0 }
 0x27a   : > { %v939_v53 = vmax.f32 %v925_v49, 0.0  ;;  %v920_v54 = vadd.f32 %v919_v51, %v4095_v46  ;;  %v4128_v51 = vmul.u32.u64.low 3817748708, %v328_v42  ;;  %v4129_v52 = vmul.u32.u64.high 3817748708, %v328_v42, %v4128_v51 }
 0x27b   : > { %v336_v62 = vshrl.u32 %v4126_v48, 4 }
 0x27c   : > { %v936_v63 = vmax.f32 %v920_v54, 0.0  ;;  %3343 = vmatpush3.msra.mxu1 %v939_v53  ;;  %v4131_v53 = vmul.u32.u64.low 3817748708, %v329_v45  ;;  %v4132_v54 = vmul.u32.u64.high 3817748708, %v329_v45, %v4131_v53 }
 0x27d   : > { %3344 = vmatprep.subr.mxu1 %v3751_v5 }
 0x27e   : > { %v820_v6 = vpop.f32.mrf.mxu1  ;;  %3345 = vmatpush3.msra.mxu1 %v936_v63  ;;  %v347_v63 = vshrl.u32 %v4129_v52, 4 }
 0x27f   : > { %3346 = vmatprep.subr.mxu1 %v3751_v5  ;;  %v821_v30 = vadd.f32 %v820_v6, %v4102_v55  ;;  %v337_v6 = vmul.u32 18, %v336_v62 }
 0x280   : > { %v822_v9 = vpop.f32.mrf.mxu1  ;;  %3347 = vmatpush3.msra.mxu1 %v933_v1  ;;  %v358_v1 = vshrl.u32 %v4132_v54, 4 }
 0x281   : > { %3348 = vmatprep.subr.mxu1 %v3751_v5  ;;  %v823_v28 = vadd.f32 %v822_v9, %v4102_v55  ;;  %v928_v36 = vmax.f32 %v821_v30, 0.0 }
 0x282   : > { %v826_v11 = vpop.f32.mrf.mxu1  ;;  %3349 = vmatpush3.msra.mxu1 %v930_v8  ;;  %v348_v8 = vmul.u32 18, %v347_v63  ;;  %v359_v9 = vmul.u32 18, %v358_v1 }
 0x283   : > { %3351 = vmatmul.mubr.msk.f32.vlgmr.msra.gmra.mxu1 %vm4759_vm10, %v4107_v10  ;;  %v827_v25 = vadd.f32 %v826_v11, %v4098_v50  ;;  %v929_v35 = vmax.f32 %v823_v28, 0.0  ;;  %v338_v11 = vsub.s32 %v327_v41, %v337_v6 }
 0x284   : > { %v828_v13 = vpop.f32.mrf.mxu1  ;;  %3371 = vmatprep.mubr.msk.f32.mxu1 %vm4760_vm1, %v3944_v4 }
 0x285   : > { %v829_v22 = vadd.f32 %v828_v13, %v4098_v50  ;;  %v931_v34 = vmax.f32 %v827_v25, 0.0  ;;  %v349_v13 = vsub.s32 %v328_v42, %v348_v8  ;;  %vm363_vm12 = vcmp.ne.s32.totalorder %v338_v11, 0 }
 0x286   : > { %v832_v14 = vpop.f32.mrf.mxu1  ;;  %vm366_vm13 = vcmp.lt.s32.totalorder %v338_v11, 0 }
 0x287   : > { %v833_v21 = vadd.f32 %v832_v14, %v4095_v46  ;;  %v932_v32 = vmax.f32 %v829_v22, 0.0  ;;  %v360_v14 = vsub.s32 %v329_v45, %v359_v9  ;;  %vm364_vm14 = vcmp.ne.s32.totalorder %v349_v13, 0  ;;  %vm369_vm0 = vmand %vm366_vm13, %vm363_vm12 }
 0x288   : > { %v834_v15 = vpop.f32.mrf.mxu1  ;;  %vm367_vm15 = vcmp.lt.s32.totalorder %v349_v13, 0  ;;  %v373_v22 = vadd.s32 18, %v349_v13 }
 0x289   : > { %v835_v19 = vadd.f32 %v834_v15, %v4095_v46  ;;  %v934_v31 = vmax.f32 %v833_v21, 0.0  ;;  %v4137_v15 = vpop.permute.xlu1 %942  ;;  %vm365_vm11 = vcmp.ne.s32.totalorder %v360_v14, 0  ;;  %vm370_vm1 = vmand %vm367_vm15, %vm364_vm14  ;;  %v374_v25 = vadd.s32 18, %v360_v14 }
 0x28a   : > { %v838_v16 = vpop.f32.mrf.mxu1  ;;  %vm4790_vm14 = vcmask 891904  }
 0x28b   : > { %v839_v17 = vadd.f32 %v838_v16, %v4093_v44  ;;  %v935_v29 = vmax.f32 %v835_v19, 0.0  ;;  %v372_v19 = vadd.s32 18, %v338_v11  ;;  %vm4791_vm15 = vmmov %vm4790_vm14 }
 0x28c   : > { %v840_v18 = vpop.f32.mrf.mxu1 }
 0x28d   : > { %v841_v20 = vadd.f32 %v840_v18, %v4093_v44  ;;  %v937_v26 = vmax.f32 %v839_v17, 0.0 }
 0x28f   : > { %v938_v23 = vmax.f32 %v841_v20, 0.0 }
 0x291   : > { %972 = vmatprep.subr.mxu0 %v938_v23  ;;  %v375_v23 = vsel %vm369_vm0, %v372_v19, %v338_v11  ;;  %vm4792_vm0 = vcmask 900096  }
 0x292   : > { %973 = vmatpush1.msra.mxu0 %v937_v26  ;;  %v376_v26 = vsel %vm370_vm1, %v373_v22, %v349_v13  ;;  %vm378_vm8 = vcmp.ge.s32.totalorder %v375_v23, 1  ;;  %vm381_vm7 = vcmp.le.s32.totalorder %v375_v23, 16  ;;  %vm1113_vm1 = vcmask 1047704  }
 0x293   : > { %974 = vmatprep.subr.mxu0 %v935_v29  ;;  %vm379_vm6 = vcmp.ge.s32.totalorder %v376_v26, 1  ;;  %vm382_vm5 = vcmp.le.s32.totalorder %v376_v26, 16  ;;  %vm384_vm4 = vmand %vm378_vm8, %vm381_vm7  ;;  %vm4786_vm8 = vcmask 752640  }
 0x294   : > { %975 = vmatpush1.msra.mxu0 %v934_v31  ;;  %vm385_vm3 = vmand %vm379_vm6, %vm382_vm5  ;;  %v4143_v29 = vsel %vm384_vm4, 1.0, %v3751_v5  ;;  %vm4782_vm4 = vcmask 736256   ;;  %vm4784_vm6 = vcmask 744448  }
 0x295   : > { %976 = vmatprep.subr.mxu0 %v932_v32  ;;  %v4146_v31 = vsel %vm385_vm3, 1.0, %v3751_v5  ;;  %vm1116_vm3 = vcmask 400384   ;;  %vm4783_vm5 = vmmov %vm4782_vm4 }
 0x296   : > { %977 = vmatpush1.msra.mxu0 %v931_v34  ;;  %vm4785_vm7 = vmmov %vm4784_vm6 }
 0x297   : > { %978 = vmatprep.subr.mxu0 %v929_v35 }
 0x298   : > { %979 = vmatpush1.msra.mxu0 %v928_v36 }
 0x299   : > { %3141 = vmatmul.mubr.msk.f32.vlgmr.msra.gmra.mxu0 %vm4759_vm10, %v4107_v10  ;;  %vm368_vm10 = vcmp.lt.s32.totalorder %v360_v14, 0 }
 0x29a   : > { %1276 = vmatprep.mubr.f32.mxu0 %v3751_v5  ;;  %vm371_vm9 = vmand %vm368_vm10, %vm365_vm11  ;;  %vm4788_vm10 = vcmask 883712  }
 0x29b   : > { %v377_v28 = vsel %vm371_vm9, %v374_v25, %v360_v14  ;;  %vm4787_vm9 = vmmov %vm4786_vm8 }
 0x29c   : > { %vm380_vm12 = vcmp.ge.s32.totalorder %v377_v28, 1  ;;  %vm383_vm13 = vcmp.le.s32.totalorder %v377_v28, 16  ;;  %vm4789_vm11 = vmmov %vm4788_vm10 }
 0x29d   : > { %vm386_vm2 = vmand %vm380_vm12, %vm383_vm13  ;;  %vm4794_vm13 = vcmask 1031168  }
 0x29e   : > { %v4150_v36 = vsel %vm386_vm2, 1.0, %v3751_v5  ;;  %vm1104_vm2 = vcmask 154624   ;;  %vm4793_vm12 = vmmov %vm4792_vm0 }
 0x343   : > { %v1085_v43 = vpop.f32.mrf.mxu1 }
 0x344   : > { %v1086_v16 = vadd.f32 %v1085_v43, %v4137_v15 }
 0x345   : > { %v3352_v49 = vpop.f32.mrf.mxu1 }
 0x359   : > { %v1014_v17 = vpop.f32.mrf.mxu0 }
 0x35a   : > { %v1015_v18 = vadd.f32 %v1014_v17, %v4137_v15 }
 0x35b   : > { %v1016_v20 = vpop.f32.mrf.mxu0 }
 0x35c   : > { %3585 = vtanh.f32 %v1015_v18  ;;  %v1017_v21 = vadd.f32 %v1016_v20, %v4137_v15 }
 0x35d   : > { %3587 = vtanh.f32 %v1086_v16 }
 0x35e   : > { %3589 = vtanh.f32 %v1017_v21 }
 0x369   : > { %v3586_v30 = vpop.eup %3585 }
 0x36a   : > { %v3588_v32 = vpop.eup %3587  ;;  %v1092_v34 = vmul.f32 %v3586_v30, %v4143_v29 }
 0x36b   : > { %v3590_v35 = vpop.eup %3589  ;;  %v1094_v38 = vmul.f32 %v3588_v32, %v4150_v36 }
 0x36c   : > { %1098 = vrot.lane.b32.xlu0 %v1092_v34, %s3755_s8  ;;  %v1093_v37 = vmul.f32 %v3590_v35, %v4146_v31 }
 0x36e   : > { %1100 = vrot.lane.b32.xlu1 %v1093_v37, %s3755_s8 }
 0x370   : > { %1102 = vrot.lane.b32.xlu0 %v1094_v38, %s3755_s8 }
 0x3de   : > { %v1099_v39 = vpop.permute.xlu0 %1098 }
 0x3df   : > { %v1110_v40 = vadd.f32 %v1099_v39, %v3896_v2 }
 0x3e0   : > { %v1101_v41 = vpop.permute.xlu1 %1100 }
 0x3e1   : > { %1114 = vst.msk [vmem:[%s3900_s21] sm:$0xff] %vm1113_vm1, %v1110_v40  ;;  %v1105_v2 = vsel %vm1104_vm2, %v1099_v39, %v1101_v41 }
 0x3e2   : > { %v1103_v42 = vpop.permute.xlu0 %1102  ;;  %v4188_v48 = vadd.f32 %v1105_v2, %v3894_v0 }
 0x3e3   : > { %v1106_v43 = vsel %vm1104_vm2, %v1101_v41, %v1103_v42 }
 0x3e4   : > { %v1112_v45 = vadd.f32 %v1106_v43, %v3910_v3 }
 0x3e6   : > { %1117 = vst.msk [vmem:[%s3900_s21 + $0x10] sm:$0xff] %vm1116_vm3, %v1112_v45 }
 0x3e8   : > { %v4165_v47 = vld [vmem:[%s3900_s21] sm:$0xff] }
 0x3e9   : > { %1190 = vrot.lane.b32.xlu0 %v4165_v47, %s3745_s22  ;;  %1201 = vrot.lane.b32.xlu1 %v4165_v47, %s3744_s20 }
 0x3ed   : > { %1168 = vrot.lane.b32.xlu0 %v4165_v47, %s3747_s29  ;;  %1179 = vrot.lane.b32.xlu1 %v4165_v47, %s4777_s9  ;;  %v4181_v3 = vld [vmem:[%s3900_s21 + $0x10] sm:$0xff] }
 0x3f1   : > { %1146 = vrot.lane.b32.xlu0 %v4165_v47, %s4778_s23  ;;  %1157 = vrot.lane.b32.xlu1 %v4165_v47, %s4779_s15 }
 0x3f5   : > { %1135 = vrot.lane.b32.xlu1 %v4165_v47, %s4780_s16  ;;  %1205 = vrot.lane.b32.xlu0 %v4181_v3, %s3744_s20 }
 0x3f9   : > { %1203 = vrot.lane.b32.xlu1 %v4188_v48, %s3744_s20  ;;  %1192 = vrot.lane.b32.xlu0 %v4188_v48, %s3745_s22 }
 0x3fd   : > { %1194 = vrot.lane.b32.xlu1 %v4181_v3, %s3745_s22  ;;  %1183 = vrot.lane.b32.xlu0 %v4181_v3, %s4777_s9 }
 0x401   : > { %1181 = vrot.lane.b32.xlu1 %v4188_v48, %s4777_s9  ;;  %1170 = vrot.lane.b32.xlu0 %v4188_v48, %s3747_s29 }
 0x405   : > { %1172 = vrot.lane.b32.xlu1 %v4181_v3, %s3747_s29  ;;  %1161 = vrot.lane.b32.xlu0 %v4181_v3, %s4779_s15 }
 0x409   : > { %1159 = vrot.lane.b32.xlu1 %v4188_v48, %s4779_s15  ;;  %1148 = vrot.lane.b32.xlu0 %v4188_v48, %s4778_s23 }
 0x40d   : > { %1150 = vrot.lane.b32.xlu1 %v4181_v3, %s4778_s23  ;;  %1139 = vrot.lane.b32.xlu0 %v4181_v3, %s4780_s16 }
 0x411   : > { %1137 = vrot.lane.b32.xlu1 %v4188_v48, %s4780_s16  ;;  %1126 = vrot.lane.b32.xlu0 %v4188_v48, %s4781_s17 }
 0x415   : > { %1128 = vrot.lane.b32.xlu1 %v4181_v3, %s4781_s17  ;;  %1124 = vrot.lane.b32.xlu0 %v4165_v47, %s4781_s17 }
 0x45b   : > { %v1202_v0 = vpop.permute.xlu1 %1201  ;;  %v1191_v49 = vpop.permute.xlu0 %1190 }
 0x45f   : > { %v1180_v51 = vpop.permute.xlu1 %1179  ;;  %v1169_v52 = vpop.permute.xlu0 %1168 }
 0x463   : > { %v1158_v53 = vpop.permute.xlu1 %1157  ;;  %v1147_v54 = vpop.permute.xlu0 %1146 }
 0x467   : > { %v1136_v62 = vpop.permute.xlu1 %1135  ;;  %v1206_v63 = vpop.permute.xlu0 %1205 }
 0x468   : > { %3353 = vmatprep.subr.mxu1 %v1206_v63 }
 0x469   : > { %3354 = vmatpush3.msra.mxu1 %v1206_v63 }
 0x46b   : > { %v1204_v1 = vpop.permute.xlu1 %1203  ;;  %v1193_v6 = vpop.permute.xlu0 %1192 }
 0x46c   : > { %v1207_v8 = vsel %vm4782_vm4, %v1202_v0, %v1204_v1  ;;  %v1208_v9 = vsel %vm4783_vm5, %v1204_v1, %v1206_v63  ;;  %v1196_v16 = vsel %vm4785_vm7, %v1191_v49, %v1193_v6  ;;  %vm4795_vm4 = vmmov %vm4794_vm13  ;;  %vm4796_vm5 = vcmask 1039360  }
 0x46d   : > { %1226 = vmatprep.subr.mxu0 %v1208_v9  ;;  %vm4798_vm7 = vcmask 588800  }
 0x46e   : > { %1227 = vmatpush1.msra.mxu0 %v1207_v8 }
 0x46f   : > { %v1195_v11 = vpop.permute.xlu1 %1194  ;;  %v1184_v13 = vpop.permute.xlu0 %1183 }
 0x470   : > { %3355 = vmatprep.subr.mxu1 %v1195_v11  ;;  %v1197_v14 = vsel %vm4784_vm6, %v1193_v6, %v1195_v11  ;;  %vm4797_vm6 = vmmov %vm4796_vm5 }
 0x471   : > { %1228 = vmatprep.subr.mxu0 %v1197_v14  ;;  %3356 = vmatpush3.msra.mxu1 %v1195_v11 }
 0x472   : > { %1229 = vmatpush1.msra.mxu0 %v1196_v16  ;;  %3357 = vmatprep.subr.mxu1 %v1184_v13 }
 0x473   : > { %v1182_v17 = vpop.permute.xlu1 %1181  ;;  %3358 = vmatpush3.msra.mxu1 %v1184_v13  ;;  %v1171_v18 = vpop.permute.xlu0 %1170 }
 0x474   : > { %v1185_v19 = vsel %vm4786_vm8, %v1180_v51, %v1182_v17  ;;  %v1186_v20 = vsel %vm4787_vm9, %v1182_v17, %v1184_v13  ;;  %v1174_v25 = vsel %vm4789_vm11, %v1169_v52, %v1171_v18  ;;  %vm4799_vm8 = vmmov %vm4798_vm7 }
 0x475   : > { %1230 = vmatprep.subr.mxu0 %v1186_v20  ;;  %vm4800_vm9 = vmmov %vm4798_vm7 }
 0x476   : > { %1231 = vmatpush1.msra.mxu0 %v1185_v19  ;;  %vm4802_vm11 = vmmov %vm4798_vm7 }
 0x477   : > { %v1173_v21 = vpop.permute.xlu1 %1172  ;;  %v1162_v22 = vpop.permute.xlu0 %1161 }
 0x478   : > { %3359 = vmatprep.subr.mxu1 %v1173_v21  ;;  %v1175_v23 = vsel %vm4788_vm10, %v1171_v18, %v1173_v21  ;;  %vm4801_vm10 = vmmov %vm4798_vm7 }
 0x479   : > { %1232 = vmatprep.subr.mxu0 %v1175_v23  ;;  %3360 = vmatpush3.msra.mxu1 %v1173_v21 }
 0x47a   : > { %1233 = vmatpush1.msra.mxu0 %v1174_v25  ;;  %3361 = vmatprep.subr.mxu1 %v1162_v22 }
 0x47b   : > { %v1160_v26 = vpop.permute.xlu1 %1159  ;;  %3362 = vmatpush3.msra.mxu1 %v1162_v22  ;;  %v1149_v28 = vpop.permute.xlu0 %1148 }
 0x47c   : > { %v1163_v30 = vsel %vm4790_vm14, %v1158_v53, %v1160_v26  ;;  %v1164_v32 = vsel %vm4791_vm15, %v1160_v26, %v1162_v22  ;;  %v1152_v38 = vsel %vm4793_vm12, %v1147_v54, %v1149_v28  ;;  %vm4803_vm14 = vmmov %vm4798_vm7 }
 0x47d   : > { %1234 = vmatprep.subr.mxu0 %v1164_v32  ;;  %vm4804_vm15 = vmmov %vm4798_vm7 }
 0x47e   : > { %1235 = vmatpush1.msra.mxu0 %v1163_v30 }
 0x47f   : > { %v1151_v34 = vpop.permute.xlu1 %1150  ;;  %v1140_v35 = vpop.permute.xlu0 %1139 }
 0x480   : > { %3363 = vmatprep.subr.mxu1 %v1151_v34  ;;  %v1153_v37 = vsel %vm4792_vm0, %v1149_v28, %v1151_v34  ;;  %vm4805_vm0 = vcmask 261120  }
 0x481   : > { %1236 = vmatprep.subr.mxu0 %v1153_v37  ;;  %3364 = vmatpush3.msra.mxu1 %v1151_v34  ;;  %vm4806_vm12 = vmmov %vm4805_vm0 }
 0x482   : > { %1237 = vmatpush1.msra.mxu0 %v1152_v38  ;;  %3365 = vmatprep.subr.mxu1 %v1140_v35 }
 0x483   : > { %v1138_v39 = vpop.permute.xlu1 %1137  ;;  %3366 = vmatpush3.msra.mxu1 %v1140_v35  ;;  %v1127_v40 = vpop.permute.xlu0 %1126 }
 0x484   : > { %v1141_v41 = vsel %vm4794_vm13, %v1136_v62, %v1138_v39  ;;  %v1142_v42 = vsel %vm4795_vm4, %v1138_v39, %v1140_v35  ;;  %vm4807_vm13 = vmmov %vm4805_vm0 }
 0x485   : > { %1238 = vmatprep.subr.mxu0 %v1142_v42  ;;  %vm4808_vm4 = vmmov %vm4805_vm0 }
 0x486   : > { %1239 = vmatpush1.msra.mxu0 %v1141_v41 }
 0x487   : > { %v1129_v43 = vpop.permute.xlu1 %1128  ;;  %v1125_v45 = vpop.permute.xlu0 %1124 }
 0x488   : > { %v1130_v2 = vsel %vm4796_vm5, %v1125_v45, %v1127_v40  ;;  %3367 = vmatprep.subr.mxu1 %v1129_v43  ;;  %v1131_v0 = vsel %vm4797_vm6, %v1127_v40, %v1129_v43  ;;  %vm4809_vm5 = vmmov %vm4805_vm0 }
 0x489   : > { %1240 = vmatprep.subr.mxu0 %v1131_v0  ;;  %3368 = vmatpush3.msra.mxu1 %v1129_v43  ;;  %vm4810_vm6 = vmmov %vm4805_vm0 }
 0x48a   : > { %1241 = vmatpush1.msra.mxu0 %v1130_v2  ;;  %3369 = vmatprep.subr.mxu1 %v4181_v3 }
 0x48b   : > { %1242 = vmatprep.subr.mxu0 %v4188_v48  ;;  %3370 = vmatpush3.msra.mxu1 %v4181_v3 }
 0x48c   : > { %1243 = vmatpush1.msra.mxu0 %v4165_v47  ;;  %3372 = vmatmul.mubr.msk.f32.vlgmr.msra.gmra.mxu1 %vm4798_vm7, %v4002_v56  ;;  %vm4811_vm7 = vmmov %vm4805_vm0 }
 0x48d   : > { %3143 = vmatmul.mubr.msk.f32.vlgmr.msra.gmra.mxu0 %vm4799_vm8, %v3944_v4  ;;  %3374 = vmatprep.mubr.msk.f32.mxu1 %vm4800_vm9, %v4005_v57  ;;  %vm4812_vm8 = vmmov %vm4805_vm0  ;;  %vm4813_vm9 = vmmov 0  }
 0x48e   : > { %1282 = vmatprep.mubr.f32.mxu0 %v3751_v5 }
 0x490   : > { %3375 = vmatmul.mubr.msk.f32.gmra.mxu1 %vm4801_vm10, %v4016_v58  ;;  %vm4814_vm10 = vmmov %vm4805_vm0 }
 0x491   : > { %3144 = vmatmul.mubr.msk.f32.gmra.mxu0 %vm4802_vm11, %v4002_v56  ;;  %1462 = vmatprep.mubr.f32.mxu1 %v3751_v5 }
 0x492   : > { %1288 = vmatprep.mubr.f32.mxu0 %v3751_v5 }
 0x495   : > { %3145 = vmatmul.mubr.msk.f32.gmra.mxu0 %vm4803_vm14, %v4005_v57  ;;  %vm4815_vm14 = vmmov %vm4805_vm0 }
 0x496   : > { %1294 = vmatprep.mubr.f32.mxu0 %v3751_v5 }
 0x499   : > { %3146 = vmatmul.mubr.msk.f32.gmra.mxu0 %vm4804_vm15, %v4016_v58  ;;  %vm4816_vm15 = vcmask 736256  }
 0x49a   : > { %3385 = vmatprep.mubr.msk.f32.mxu0 %vm4805_vm0, %v4033_v59  ;;  %vm4817_vm0 = vmmov %vm4816_vm15 }
 0x54c   : > { %v3373_v4 = vpop.f32.mrf.mxu1 }
 0x54d   : > { %v1278_v49 = vpop.f32.mrf.mxu0  ;;  %v1373_v63 = vadd.f32 %v3373_v4, %v4041_v7 }
 0x54e   : > { %v1367_v51 = vpop.f32.mrf.mxu1  ;;  %v1279_v32 = vadd.f32 %v1278_v49, %v4045_v12 }
 0x54f   : > { %v1280_v52 = vpop.f32.mrf.mxu0  ;;  %v1368_v58 = vadd.f32 %v1367_v51, %v4045_v12  ;;  %v1391_v11 = vmax.f32 %v1373_v63, 0.0 }
 0x550   : > { %v3376_v56 = vpop.f32.mrf.mxu1  ;;  %v1281_v28 = vadd.f32 %v1280_v52, %v4045_v12  ;;  %v1386_v39 = vmax.f32 %v1279_v32, 0.0 }
 0x551   : > { %v1383_v53 = vadd.f32 %v3376_v56, %v4039_v61  ;;  %v1284_v54 = vpop.f32.mrf.mxu0  ;;  %v1388_v14 = vmax.f32 %v1368_v58, 0.0 }
 0x552   : > { %v1377_v62 = vpop.f32.mrf.mxu1  ;;  %v1285_v25 = vadd.f32 %v1284_v54, %v4041_v7  ;;  %v1387_v38 = vmax.f32 %v1281_v28, 0.0 }
 0x553   : > { %v1397_v57 = vmax.f32 %v1383_v53, 0.0  ;;  %v1378_v1 = vadd.f32 %v1377_v62, %v4037_v60  ;;  %v1286_v6 = vpop.f32.mrf.mxu0  ;;  %v4304_v53 = vld [vmem:[#allocation2] sm:$0xff] }
 0x554   : > { %v1287_v22 = vadd.f32 %v1286_v6, %v4041_v7  ;;  %v1389_v37 = vmax.f32 %v1285_v25, 0.0 }
 0x555   : > { %v1394_v8 = vmax.f32 %v1378_v1, 0.0  ;;  %v1290_v9 = vpop.f32.mrf.mxu0  ;;  %3377 = vmatprep.subr.mxu0 %v1397_v57 }
 0x556   : > { %3378 = vmatpush3.msra.mxu0 %v1397_v57  ;;  %v1291_v21 = vadd.f32 %v1290_v9, %v4037_v60  ;;  %v1390_v35 = vmax.f32 %v1287_v22, 0.0 }
 0x557   : > { %v1292_v13 = vpop.f32.mrf.mxu0  ;;  %3379 = vmatprep.subr.mxu0 %v1394_v8 }
 0x558   : > { %3380 = vmatpush3.msra.mxu0 %v1394_v8  ;;  %v1293_v19 = vadd.f32 %v1292_v13, %v4037_v60  ;;  %v1392_v34 = vmax.f32 %v1291_v21, 0.0 }
 0x559   : > { %v1296_v16 = vpop.f32.mrf.mxu0  ;;  %3381 = vmatprep.subr.mxu0 %v1391_v11 }
 0x55a   : > { %3382 = vmatpush3.msra.mxu0 %v1391_v11  ;;  %v1297_v17 = vadd.f32 %v1296_v16, %v4039_v61  ;;  %v1393_v30 = vmax.f32 %v1293_v19, 0.0 }
 0x55b   : > { %v1298_v18 = vpop.f32.mrf.mxu0  ;;  %3383 = vmatprep.subr.mxu0 %v1388_v14 }
 0x55c   : > { %v1299_v20 = vadd.f32 %v1298_v18, %v4039_v61  ;;  %3384 = vmatpush3.msra.mxu0 %v1388_v14  ;;  %v1395_v26 = vmax.f32 %v1297_v17, 0.0 }
 0x55d   : > { %3386 = vmatmul.mubr.msk.f32.vlgmr.msra.gmra.mxu0 %vm4806_vm12, %v4052_v24  ;;  %vm4818_vm12 = vcmask 744448  }
 0x55e   : > { %v1396_v23 = vmax.f32 %v1299_v20, 0.0  ;;  %3388 = vmatprep.mubr.msk.f32.mxu0 %vm4807_vm13, %v4058_v27  ;;  %vm4819_vm13 = vmmov %vm4818_vm12 }
 0x560   : > { %1422 = vmatprep.subr.mxu1 %v1396_v23 }
 0x561   : > { %1423 = vmatpush1.msra.mxu1 %v1395_v26  ;;  %3389 = vmatmul.mubr.msk.f32.gmra.mxu0 %vm4808_vm4, %v4071_v33  ;;  %vm4820_vm4 = vcmask 752640  }
 0x562   : > { %1424 = vmatprep.subr.mxu1 %v1393_v30  ;;  %1648 = vmatprep.mubr.f32.mxu0 %v3751_v5 }
 0x563   : > { %1425 = vmatpush1.msra.mxu1 %v1392_v34 }
 0x564   : > { %1426 = vmatprep.subr.mxu1 %v1390_v35 }
 0x565   : > { %1427 = vmatpush1.msra.mxu1 %v1389_v37 }
 0x566   : > { %1428 = vmatprep.subr.mxu1 %v1387_v38 }
 0x567   : > { %1429 = vmatpush1.msra.mxu1 %v1386_v39 }
 0x568   : > { %3151 = vmatmul.mubr.msk.f32.vlgmr.msra.gmra.mxu1 %vm4809_vm5, %v4033_v59  ;;  %3391 = vmatprep.subr.mxu1 %v3751_v5  ;;  %vm4821_vm5 = vmmov %vm4820_vm4 }
 0x569   : > { %1468 = vmatprep.mubr.f32.mxu1 %v3751_v5 }
 0x56c   : > { %3152 = vmatmul.mubr.msk.f32.gmra.mxu1 %vm4810_vm6, %v4052_v24  ;;  %vm4822_vm6 = vcmask 883712  }
 0x56d   : > { %1474 = vmatprep.mubr.f32.mxu1 %v3751_v5 }
 0x570   : > { %3153 = vmatmul.mubr.msk.f32.gmra.mxu1 %vm4811_vm7, %v4058_v27  ;;  %vm4823_vm7 = vmmov %vm4822_vm6 }
 0x571   : > { %1480 = vmatprep.mubr.f32.mxu1 %v3751_v5 }
 0x574   : > { %3154 = vmatmul.mubr.msk.f32.gmra.mxu1 %vm4812_vm8, %v4071_v33  ;;  %vm4824_vm8 = vcmask 891904  }
 0x575   : > { %3399 = vmatprep.mubr.msk.f32.mxu1 %vm4813_vm9, %v3751_v5 }
 0x61d   : > { %v3387_v59 = vpop.f32.mrf.mxu0 }
 0x61e   : > { %v1559_v24 = vadd.f32 %v3387_v59, %v4098_v50 }
 0x61f   : > { %v1553_v40 = vpop.f32.mrf.mxu0 }
 0x620   : > { %v1554_v27 = vadd.f32 %v1553_v40, %v4102_v55  ;;  %v1577_v33 = vmax.f32 %v1559_v24, 0.0 }
 0x621   : > { %v3390_v41 = vpop.f32.mrf.mxu0 }
 0x622   : > { %v1569_v42 = vadd.f32 %v3390_v41, %v4093_v44  ;;  %v1574_v49 = vmax.f32 %v1554_v27, 0.0 }
 0x623   : > { %v1563_v43 = vpop.f32.mrf.mxu0 }
 0x624   : > { %v1583_v45 = vmax.f32 %v1569_v42, 0.0  ;;  %v1564_v2 = vadd.f32 %v1563_v43, %v4095_v46 }
 0x626   : > { %v1580_v0 = vmax.f32 %v1564_v2, 0.0  ;;  %3392 = vmatpush3.msra.mxu1 %v1583_v45 }
 0x627   : > { %3393 = vmatprep.subr.mxu1 %v3751_v5 }
 0x628   : > { %v1464_v4 = vpop.f32.mrf.mxu1  ;;  %3394 = vmatpush3.msra.mxu1 %v1580_v0 }
 0x629   : > { %3395 = vmatprep.subr.mxu1 %v3751_v5  ;;  %v1465_v18 = vadd.f32 %v1464_v4, %v4102_v55 }
 0x62a   : > { %v1466_v51 = vpop.f32.mrf.mxu1  ;;  %3396 = vmatpush3.msra.mxu1 %v1577_v33 }
 0x62b   : > { %3397 = vmatprep.subr.mxu1 %v3751_v5  ;;  %v1467_v16 = vadd.f32 %v1466_v51, %v4102_v55  ;;  %v1572_v23 = vmax.f32 %v1465_v18, 0.0 }
 0x62c   : > { %v1470_v52 = vpop.f32.mrf.mxu1  ;;  %3398 = vmatpush3.msra.mxu1 %v1574_v49 }
 0x62d   : > { %3400 = vmatmul.mubr.msk.f32.vlgmr.msra.gmra.mxu1 %vm4814_vm10, %v4107_v10  ;;  %v1471_v13 = vadd.f32 %v1470_v52, %v4098_v50  ;;  %v1573_v22 = vmax.f32 %v1467_v16, 0.0  ;;  %vm4825_vm10 = vmmov %vm4824_vm8 }
 0x62e   : > { %v1472_v56 = vpop.f32.mrf.mxu1  ;;  %3420 = vmatprep.mubr.msk.f32.mxu1 %vm4802_vm11, %v4304_v53  ;;  %vm4826_vm11 = vcmask 900096  }
 0x62f   : > { %v1473_v9 = vadd.f32 %v1472_v56, %v4098_v50  ;;  %v1575_v21 = vmax.f32 %v1471_v13, 0.0 }
 0x630   : > { %v1476_v54 = vpop.f32.mrf.mxu1 }
 0x631   : > { %v1477_v8 = vadd.f32 %v1476_v54, %v4095_v46  ;;  %v1576_v20 = vmax.f32 %v1473_v9, 0.0 }
 0x632   : > { %v1478_v62 = vpop.f32.mrf.mxu1 }
 0x633   : > { %v1479_v6 = vadd.f32 %v1478_v62, %v4095_v46  ;;  %v1578_v19 = vmax.f32 %v1477_v8, 0.0 }
 0x634   : > { %v1482_v63 = vpop.f32.mrf.mxu1 }
 0x635   : > { %v1483_v57 = vadd.f32 %v1482_v63, %v4093_v44  ;;  %v1579_v17 = vmax.f32 %v1479_v6, 0.0 }
 0x636   : > { %v1484_v1 = vpop.f32.mrf.mxu1 }
 0x637   : > { %v1485_v58 = vadd.f32 %v1484_v1, %v4093_v44  ;;  %v1581_v14 = vmax.f32 %v1483_v57, 0.0 }
 0x639   : > { %v1582_v11 = vmax.f32 %v1485_v58, 0.0 }
 0x63b   : > { %1608 = vmatprep.subr.mxu0 %v1582_v11 }
 0x63c   : > { %1609 = vmatpush1.msra.mxu0 %v1581_v14 }
 0x63d   : > { %1610 = vmatprep.subr.mxu0 %v1579_v17 }
 0x63e   : > { %1611 = vmatpush1.msra.mxu0 %v1578_v19 }
 0x63f   : > { %1612 = vmatprep.subr.mxu0 %v1576_v20 }
 0x640   : > { %1613 = vmatpush1.msra.mxu0 %v1575_v21 }
 0x641   : > { %1614 = vmatprep.subr.mxu0 %v1573_v22 }
 0x642   : > { %1615 = vmatpush1.msra.mxu0 %v1572_v23 }
 0x643   : > { %3159 = vmatmul.mubr.msk.f32.vlgmr.msra.gmra.mxu0 %vm4815_vm14, %v4107_v10  ;;  %vm4827_vm14 = vmmov %vm4826_vm11 }
 0x644   : > { %1909 = vmatprep.mubr.f32.mxu0 %v3751_v5 }
 0x6ed   : > { %v1721_v25 = vpop.f32.mrf.mxu1 }
 0x6ee   : > { %v1722_v28 = vadd.f32 %v1721_v25, %v4137_v15 }
 0x6ef   : > { %v3401_v26 = vpop.f32.mrf.mxu1 }
 0x703   : > { %v1650_v30 = vpop.f32.mrf.mxu0 }
 0x704   : > { %v1651_v32 = vadd.f32 %v1650_v30, %v4137_v15 }
 0x705   : > { %v1652_v34 = vpop.f32.mrf.mxu0 }
 0x706   : > { %3591 = vtanh.f32 %v1651_v32  ;;  %v1653_v35 = vadd.f32 %v1652_v34, %v4137_v15 }
 0x707   : > { %3593 = vtanh.f32 %v1722_v28 }
 0x708   : > { %3595 = vtanh.f32 %v1653_v35 }
 0x713   : > { %v3592_v37 = vpop.eup %3591 }
 0x714   : > { %v3594_v38 = vpop.eup %3593  ;;  %v1728_v10 = vmul.f32 %v3592_v37, %v4143_v29 }
 0x715   : > { %v3596_v39 = vpop.eup %3595  ;;  %v1730_v40 = vmul.f32 %v3594_v38, %v4150_v36 }
 0x716   : > { %1734 = vrot.lane.b32.xlu1 %v1728_v10, %s3755_s8  ;;  %v1729_v59 = vmul.f32 %v3596_v39, %v4146_v31 }
 0x718   : > { %1736 = vrot.lane.b32.xlu0 %v1729_v59, %s3755_s8 }
 0x71a   : > { %1738 = vrot.lane.b32.xlu1 %v1730_v40, %s3755_s8 }
 0x788   : > { %v1735_v41 = vpop.permute.xlu1 %1734 }
 0x789   : > { %v1745_v42 = vadd.f32 %v1735_v41, %v4165_v47 }
 0x78a   : > { %v1737_v43 = vpop.permute.xlu0 %1736 }
 0x78b   : > { %1748 = vst.msk [vmem:[%s3900_s21] sm:$0xff] %vm1113_vm1, %v1745_v42  ;;  %v1740_v47 = vsel %vm1104_vm2, %v1735_v41, %v1737_v43  ;;  %v4413_v41 = vld [vmem:[#allocation2 + $0x8] sm:$0xff]  ;;  %v4419_v42 = vld [vmem:[#allocation2 + $0x10] sm:$0xff] }
 0x78c   : > { %v1739_v24 = vpop.permute.xlu1 %1738  ;;  %v4359_v0 = vadd.f32 %v1740_v47, %v4188_v48 }
 0x78d   : > { %v1741_v45 = vsel %vm1104_vm2, %v1737_v43, %v1739_v24  ;;  %v4424_v43 = vld [vmem:[#allocation2 + $0x18] sm:$0xff]  ;;  %v4440_v24 = vld [vmem:[%s4740_s3] sm:$0xff] }
 0x78e   : > { %v1747_v2 = vadd.f32 %v1741_v45, %v4181_v3 }
 0x790   : > { %1750 = vst.msk [vmem:[%s3900_s21 + $0x10] sm:$0xff] %vm1116_vm3, %v1747_v2 }
 0x792   : > { %v4336_v27 = vld [vmem:[%s3900_s21] sm:$0xff] }
 0x793   : > { %1823 = vrot.lane.b32.xlu1 %v4336_v27, %s3745_s22  ;;  %1834 = vrot.lane.b32.xlu0 %v4336_v27, %s3744_s20 }
 0x797   : > { %1801 = vrot.lane.b32.xlu1 %v4336_v27, %s3747_s29  ;;  %1812 = vrot.lane.b32.xlu0 %v4336_v27, %s4777_s9  ;;  %v4352_v3 = vld [vmem:[%s3900_s21 + $0x10] sm:$0xff] }
 0x79b   : > { %1779 = vrot.lane.b32.xlu1 %v4336_v27, %s4778_s23  ;;  %1790 = vrot.lane.b32.xlu0 %v4336_v27, %s4779_s15 }
 0x79f   : > { %1768 = vrot.lane.b32.xlu0 %v4336_v27, %s4780_s16  ;;  %1838 = vrot.lane.b32.xlu1 %v4352_v3, %s3744_s20 }
 0x7a3   : > { %1836 = vrot.lane.b32.xlu0 %v4359_v0, %s3744_s20  ;;  %1825 = vrot.lane.b32.xlu1 %v4359_v0, %s3745_s22 }
 0x7a7   : > { %1827 = vrot.lane.b32.xlu0 %v4352_v3, %s3745_s22  ;;  %1816 = vrot.lane.b32.xlu1 %v4352_v3, %s4777_s9 }
 0x7ab   : > { %1814 = vrot.lane.b32.xlu0 %v4359_v0, %s4777_s9  ;;  %1803 = vrot.lane.b32.xlu1 %v4359_v0, %s3747_s29 }
 0x7af   : > { %1805 = vrot.lane.b32.xlu0 %v4352_v3, %s3747_s29  ;;  %1794 = vrot.lane.b32.xlu1 %v4352_v3, %s4779_s15 }
 0x7b3   : > { %1792 = vrot.lane.b32.xlu0 %v4359_v0, %s4779_s15  ;;  %1781 = vrot.lane.b32.xlu1 %v4359_v0, %s4778_s23 }
 0x7b7   : > { %1783 = vrot.lane.b32.xlu0 %v4352_v3, %s4778_s23  ;;  %1772 = vrot.lane.b32.xlu1 %v4352_v3, %s4780_s16 }
 0x7bb   : > { %1770 = vrot.lane.b32.xlu0 %v4359_v0, %s4780_s16  ;;  %1759 = vrot.lane.b32.xlu1 %v4359_v0, %s4781_s17 }
 0x7bf   : > { %1761 = vrot.lane.b32.xlu0 %v4352_v3, %s4781_s17  ;;  %1757 = vrot.lane.b32.xlu1 %v4336_v27, %s4781_s17 }
 0x805   : > { %v1835_v48 = vpop.permute.xlu0 %1834  ;;  %v1824_v33 = vpop.permute.xlu1 %1823 }
 0x809   : > { %v1813_v4 = vpop.permute.xlu0 %1812  ;;  %v1802_v49 = vpop.permute.xlu1 %1801 }
 0x80d   : > { %v1791_v51 = vpop.permute.xlu0 %1790  ;;  %v1780_v52 = vpop.permute.xlu1 %1779 }
 0x811   : > { %v1769_v56 = vpop.permute.xlu0 %1768  ;;  %v1839_v54 = vpop.permute.xlu1 %1838 }
 0x812   : > { %3402 = vmatprep.subr.mxu1 %v1839_v54 }
 0x813   : > { %3403 = vmatpush3.msra.mxu1 %v1839_v54 }
 0x815   : > { %v1837_v62 = vpop.permute.xlu0 %1836  ;;  %v1826_v63 = vpop.permute.xlu1 %1825 }
 0x816   : > { %v1840_v57 = vsel %vm4816_vm15, %v1835_v48, %v1837_v62  ;;  %v1841_v1 = vsel %vm4817_vm0, %v1837_v62, %v1839_v54  ;;  %v1829_v9 = vsel %vm4819_vm13, %v1824_v33, %v1826_v63  ;;  %vm4828_vm15 = vcmask 1031168  }
 0x817   : > { %1859 = vmatprep.subr.mxu0 %v1841_v1  ;;  %vm4829_vm0 = vmmov %vm4828_vm15 }
 0x818   : > { %1860 = vmatpush1.msra.mxu0 %v1840_v57 }
 0x819   : > { %v1828_v6 = vpop.permute.xlu0 %1827  ;;  %v1817_v58 = vpop.permute.xlu1 %1816 }
 0x81a   : > { %3404 = vmatprep.subr.mxu1 %v1828_v6  ;;  %v1830_v8 = vsel %vm4818_vm12, %v1826_v63, %v1828_v6  ;;  %vm4830_vm12 = vcmask 1039360  }
 0x81b   : > { %1861 = vmatprep.subr.mxu0 %v1830_v8  ;;  %3405 = vmatpush3.msra.mxu1 %v1828_v6  ;;  %vm4831_vm13 = vmmov %vm4830_vm12 }
 0x81c   : > { %1862 = vmatpush1.msra.mxu0 %v1829_v9  ;;  %3406 = vmatprep.subr.mxu1 %v1817_v58 }
 0x81d   : > { %v1815_v11 = vpop.permute.xlu0 %1814  ;;  %3407 = vmatpush3.msra.mxu1 %v1817_v58  ;;  %v1804_v13 = vpop.permute.xlu1 %1803 }
 0x81e   : > { %v1818_v14 = vsel %vm4820_vm4, %v1813_v4, %v1815_v11  ;;  %v1819_v16 = vsel %vm4821_vm5, %v1815_v11, %v1817_v58  ;;  %v1807_v20 = vsel %vm4823_vm7, %v1802_v49, %v1804_v13  ;;  %vm4832_vm4 = vcmask 588800  }
 0x81f   : > { %1863 = vmatprep.subr.mxu0 %v1819_v16  ;;  %vm4833_vm5 = vmmov %vm4832_vm4 }
 0x820   : > { %1864 = vmatpush1.msra.mxu0 %v1818_v14  ;;  %vm4835_vm7 = vmmov %vm4832_vm4 }
 0x821   : > { %v1806_v17 = vpop.permute.xlu0 %1805  ;;  %v1795_v18 = vpop.permute.xlu1 %1794 }
 0x822   : > { %3408 = vmatprep.subr.mxu1 %v1806_v17  ;;  %v1808_v19 = vsel %vm4822_vm6, %v1804_v13, %v1806_v17  ;;  %vm4834_vm6 = vmmov %vm4832_vm4 }
 0x823   : > { %1865 = vmatprep.subr.mxu0 %v1808_v19  ;;  %3409 = vmatpush3.msra.mxu1 %v1806_v17 }
 0x824   : > { %1866 = vmatpush1.msra.mxu0 %v1807_v20  ;;  %3410 = vmatprep.subr.mxu1 %v1795_v18 }
 0x825   : > { %v1793_v21 = vpop.permute.xlu0 %1792  ;;  %3411 = vmatpush3.msra.mxu1 %v1795_v18  ;;  %v1782_v22 = vpop.permute.xlu1 %1781 }
 0x826   : > { %v1796_v23 = vsel %vm4824_vm8, %v1791_v51, %v1793_v21  ;;  %v1797_v25 = vsel %vm4825_vm10, %v1793_v21, %v1795_v18  ;;  %v1785_v32 = vsel %vm4827_vm14, %v1780_v52, %v1782_v22  ;;  %vm4836_vm8 = vmmov %vm4832_vm4  ;;  %vm4839_vm14 = vcmask 261120   ;;  %v4455_v18 = vld [vmem:[%s4740_s3 + $0x8] sm:$0xff]  ;;  %v4463_v21 = vld [vmem:[%s4740_s3 + $0x10] sm:$0xff] }
 0x827   : > { %1867 = vmatprep.subr.mxu0 %v1797_v25  ;;  %vm4837_vm10 = vmmov %vm4832_vm4 }
 0x828   : > { %1868 = vmatpush1.msra.mxu0 %v1796_v23 }
 0x829   : > { %v1784_v26 = vpop.permute.xlu0 %1783  ;;  %v1773_v28 = vpop.permute.xlu1 %1772 }
 0x82a   : > { %3412 = vmatprep.subr.mxu1 %v1784_v26  ;;  %v1786_v30 = vsel %vm4826_vm11, %v1782_v22, %v1784_v26  ;;  %vm4838_vm11 = vmmov %vm4832_vm4 }
 0x82b   : > { %1869 = vmatprep.subr.mxu0 %v1786_v30  ;;  %3413 = vmatpush3.msra.mxu1 %v1784_v26 }
 0x82c   : > { %1870 = vmatpush1.msra.mxu0 %v1785_v32  ;;  %3414 = vmatprep.subr.mxu1 %v1773_v28  ;;  %v4473_v32 = vld [vmem:[%s4740_s3 + $0x18] sm:$0xff] }
 0x82d   : > { %v1771_v34 = vpop.permute.xlu0 %1770  ;;  %3415 = vmatpush3.msra.mxu1 %v1773_v28  ;;  %v1760_v35 = vpop.permute.xlu1 %1759 }
 0x82e   : > { %v1774_v37 = vsel %vm4828_vm15, %v1769_v56, %v1771_v34  ;;  %v1775_v38 = vsel %vm4829_vm0, %v1771_v34, %v1773_v28  ;;  %vm4840_vm15 = vmmov %vm4839_vm14 }
 0x82f   : > { %1871 = vmatprep.subr.mxu0 %v1775_v38  ;;  %vm4841_vm0 = vmmov %vm4839_vm14 }
 0x830   : > { %1872 = vmatpush1.msra.mxu0 %v1774_v37 }
 0x831   : > { %v1762_v10 = vpop.permute.xlu0 %1761  ;;  %v1758_v39 = vpop.permute.xlu1 %1757 }
 0x832   : > { %v1763_v59 = vsel %vm4830_vm12, %v1758_v39, %v1760_v35  ;;  %3416 = vmatprep.subr.mxu1 %v1762_v10  ;;  %v1764_v40 = vsel %vm4831_vm13, %v1760_v35, %v1762_v10  ;;  %vm4842_vm12 = vmmov %vm4841_vm0 }
 0x833   : > { %1873 = vmatprep.subr.mxu0 %v1764_v40  ;;  %3417 = vmatpush3.msra.mxu1 %v1762_v10  ;;  %vm4843_vm13 = vmmov %vm4841_vm0 }
 0x834   : > { %1874 = vmatpush1.msra.mxu0 %v1763_v59  ;;  %3418 = vmatprep.subr.mxu1 %v4352_v3 }
 0x835   : > { %1875 = vmatprep.subr.mxu0 %v4359_v0  ;;  %3419 = vmatpush3.msra.mxu1 %v4352_v3 }
 0x836   : > { %1876 = vmatpush1.msra.mxu0 %v4336_v27  ;;  %3421 = vmatmul.mubr.msk.f32.vlgmr.msra.gmra.mxu1 %vm4832_vm4, %v4413_v41  ;;  %vm4844_vm4 = vmmov %vm4841_vm0 }
 0x837   : > { %3161 = vmatmul.mubr.msk.f32.vlgmr.msra.gmra.mxu0 %vm4833_vm5, %v4304_v53  ;;  %3423 = vmatprep.mubr.msk.f32.mxu1 %vm4834_vm6, %v4419_v42  ;;  %vm4845_vm5 = vmmov %vm4841_vm0 }
 0x838   : > { %1915 = vmatprep.mubr.f32.mxu0 %v3751_v5  ;;  %vm4846_vm6 = vmmov %vm4841_vm0 }
 0x83a   : > { %3424 = vmatmul.mubr.msk.f32.gmra.mxu1 %vm4835_vm7, %v4424_v43  ;;  %vm4847_vm7 = vmmov %vm4841_vm0 }
 0x83b   : > { %3162 = vmatmul.mubr.msk.f32.gmra.mxu0 %vm4836_vm8, %v4413_v41  ;;  %2095 = vmatprep.mubr.f32.mxu1 %v3751_v5 }
 0x83c   : > { %1921 = vmatprep.mubr.f32.mxu0 %v3751_v5 }
 0x83f   : > { %3163 = vmatmul.mubr.msk.f32.gmra.mxu0 %vm4837_vm10, %v4419_v42  ;;  %vm4848_vm10 = vmmov %vm4841_vm0 }
 0x840   : > { %1927 = vmatprep.mubr.f32.mxu0 %v3751_v5 }
 0x843   : > { %3164 = vmatmul.mubr.msk.f32.gmra.mxu0 %vm4838_vm11, %v4424_v43  ;;  %vm4849_vm11 = vcmask 736256  }
 0x844   : > { %3434 = vmatprep.mubr.msk.f32.mxu0 %vm4839_vm14, %v4440_v24  ;;  %vm4850_vm14 = vmmov %vm4849_vm11 }
 0x8f6   : > { %v3422_v45 = vpop.f32.mrf.mxu1 }
 0x8f7   : > { %v1911_v2 = vpop.f32.mrf.mxu0  ;;  %v2006_v52 = vadd.f32 %v3422_v45, %v4041_v7 }
 0x8f8   : > { %v2000_v47 = vpop.f32.mrf.mxu1  ;;  %v1912_v28 = vadd.f32 %v1911_v2, %v4045_v12 }
 0x8f9   : > { %v1913_v48 = vpop.f32.mrf.mxu0  ;;  %v2001_v63 = vadd.f32 %v2000_v47, %v4045_v12  ;;  %v2024_v6 = vmax.f32 %v2006_v52, 0.0 }
 0x8fa   : > { %v3425_v33 = vpop.f32.mrf.mxu1  ;;  %v1914_v25 = vadd.f32 %v1913_v48, %v4045_v12  ;;  %v2019_v38 = vmax.f32 %v1912_v28, 0.0 }
 0x8fb   : > { %v2016_v4 = vadd.f32 %v3425_v33, %v4039_v61  ;;  %v1917_v49 = vpop.f32.mrf.mxu0  ;;  %v2021_v8 = vmax.f32 %v2001_v63, 0.0 }
 0x8fc   : > { %v2010_v51 = vpop.f32.mrf.mxu1  ;;  %v1918_v22 = vadd.f32 %v1917_v49, %v4041_v7  ;;  %v2020_v37 = vmax.f32 %v1914_v25, 0.0 }
 0x8fd   : > { %v2030_v56 = vmax.f32 %v2016_v4, 0.0  ;;  %v2011_v54 = vadd.f32 %v2010_v51, %v4037_v60  ;;  %v1919_v62 = vpop.f32.mrf.mxu0 }
 0x8fe   : > { %v1920_v19 = vadd.f32 %v1919_v62, %v4041_v7  ;;  %v2022_v35 = vmax.f32 %v1918_v22, 0.0  ;;  %v4499_v62 = vld [vmem:[#allocation5] sm:$0xff] }
 0x8ff   : > { %v2027_v57 = vmax.f32 %v2011_v54, 0.0  ;;  %v1923_v1 = vpop.f32.mrf.mxu0  ;;  %3426 = vmatprep.subr.mxu0 %v2030_v56 }
 0x900   : > { %3427 = vmatpush3.msra.mxu0 %v2030_v56  ;;  %v1924_v17 = vadd.f32 %v1923_v1, %v4037_v60  ;;  %v2023_v34 = vmax.f32 %v1920_v19, 0.0 }
 0x901   : > { %v1925_v58 = vpop.f32.mrf.mxu0  ;;  %3428 = vmatprep.subr.mxu0 %v2027_v57 }
 0x902   : > { %3429 = vmatpush3.msra.mxu0 %v2027_v57  ;;  %v1926_v14 = vadd.f32 %v1925_v58, %v4037_v60  ;;  %v2025_v30 = vmax.f32 %v1924_v17, 0.0 }
 0x903   : > { %v1929_v9 = vpop.f32.mrf.mxu0  ;;  %3430 = vmatprep.subr.mxu0 %v2024_v6 }
 0x904   : > { %3431 = vmatpush3.msra.mxu0 %v2024_v6  ;;  %v1930_v11 = vadd.f32 %v1929_v9, %v4039_v61  ;;  %v2026_v26 = vmax.f32 %v1926_v14, 0.0 }
 0x905   : > { %v1931_v13 = vpop.f32.mrf.mxu0  ;;  %3432 = vmatprep.subr.mxu0 %v2021_v8 }
 0x906   : > { %v1932_v16 = vadd.f32 %v1931_v13, %v4039_v61  ;;  %3433 = vmatpush3.msra.mxu0 %v2021_v8  ;;  %v2028_v23 = vmax.f32 %v1930_v11, 0.0 }
 0x907   : > { %3435 = vmatmul.mubr.msk.f32.vlgmr.msra.gmra.mxu0 %vm4840_vm15, %v4455_v18  ;;  %vm4851_vm15 = vcmask 744448  }
 0x908   : > { %v2029_v20 = vmax.f32 %v1932_v16, 0.0  ;;  %3437 = vmatprep.mubr.msk.f32.mxu0 %vm4841_vm0, %v4463_v21  ;;  %vm4852_vm0 = vmmov %vm4851_vm15 }
 0x90a   : > { %2055 = vmatprep.subr.mxu1 %v2029_v20 }
 0x90b   : > { %2056 = vmatpush1.msra.mxu1 %v2028_v23  ;;  %3438 = vmatmul.mubr.msk.f32.gmra.mxu0 %vm4842_vm12, %v4473_v32  ;;  %vm4853_vm12 = vcmask 752640  }
 0x90c   : > { %2057 = vmatprep.subr.mxu1 %v2026_v26  ;;  %2281 = vmatprep.mubr.f32.mxu0 %v3751_v5 }
 0x90d   : > { %2058 = vmatpush1.msra.mxu1 %v2025_v30 }
 0x90e   : > { %2059 = vmatprep.subr.mxu1 %v2023_v34 }
 0x90f   : > { %2060 = vmatpush1.msra.mxu1 %v2022_v35 }
 0x910   : > { %2061 = vmatprep.subr.mxu1 %v2020_v37 }
 0x911   : > { %2062 = vmatpush1.msra.mxu1 %v2019_v38 }
 0x912   : > { %3169 = vmatmul.mubr.msk.f32.vlgmr.msra.gmra.mxu1 %vm4843_vm13, %v4440_v24  ;;  %3440 = vmatprep.subr.mxu1 %v3751_v5  ;;  %vm4854_vm13 = vmmov %vm4853_vm12 }
 0x913   : > { %2101 = vmatprep.mubr.f32.mxu1 %v3751_v5 }
 0x916   : > { %3170 = vmatmul.mubr.msk.f32.gmra.mxu1 %vm4844_vm4, %v4455_v18  ;;  %vm4855_vm4 = vcmask 883712  }
 0x917   : > { %2107 = vmatprep.mubr.f32.mxu1 %v3751_v5 }
 0x91a   : > { %3171 = vmatmul.mubr.msk.f32.gmra.mxu1 %vm4845_vm5, %v4463_v21  ;;  %vm4856_vm5 = vmmov %vm4855_vm4 }
 0x91b   : > { %2113 = vmatprep.mubr.f32.mxu1 %v3751_v5 }
 0x91e   : > { %3172 = vmatmul.mubr.msk.f32.gmra.mxu1 %vm4846_vm6, %v4473_v32  ;;  %vm4857_vm6 = vcmask 891904  }
 0x91f   : > { %3448 = vmatprep.mubr.msk.f32.mxu1 %vm4813_vm9, %v3751_v5 }
 0x9c7   : > { %v3436_v10 = vpop.f32.mrf.mxu0 }
 0x9c8   : > { %v2192_v2 = vadd.f32 %v3436_v10, %v4098_v50 }
 0x9c9   : > { %v2186_v39 = vpop.f32.mrf.mxu0 }
 0x9ca   : > { %v2187_v33 = vadd.f32 %v2186_v39, %v4102_v55  ;;  %v2210_v49 = vmax.f32 %v2192_v2, 0.0 }
 0x9cb   : > { %v3439_v59 = vpop.f32.mrf.mxu0 }
 0x9cc   : > { %v2202_v40 = vadd.f32 %v3439_v59, %v4093_v44  ;;  %v2207_v52 = vmax.f32 %v2187_v33, 0.0 }
 0x9cd   : > { %v2196_v45 = vpop.f32.mrf.mxu0 }
 0x9ce   : > { %v2216_v47 = vmax.f32 %v2202_v40, 0.0  ;;  %v2197_v48 = vadd.f32 %v2196_v45, %v4095_v46 }
 0x9d0   : > { %v2213_v4 = vmax.f32 %v2197_v48, 0.0  ;;  %3441 = vmatpush3.msra.mxu1 %v2216_v47 }
 0x9d1   : > { %3442 = vmatprep.subr.mxu1 %v3751_v5 }
 0x9d2   : > { %v2097_v51 = vpop.f32.mrf.mxu1  ;;  %3443 = vmatpush3.msra.mxu1 %v2213_v4 }
 0x9d3   : > { %3444 = vmatprep.subr.mxu1 %v3751_v5  ;;  %v2098_v23 = vadd.f32 %v2097_v51, %v4102_v55 }
 0x9d4   : > { %v2099_v56 = vpop.f32.mrf.mxu1  ;;  %3445 = vmatpush3.msra.mxu1 %v2210_v49 }
 0x9d5   : > { %3446 = vmatprep.subr.mxu1 %v3751_v5  ;;  %v2100_v20 = vadd.f32 %v2099_v56, %v4102_v55  ;;  %v2205_v34 = vmax.f32 %v2098_v23, 0.0 }
 0x9d6   : > { %v2103_v54 = vpop.f32.mrf.mxu1  ;;  %3447 = vmatpush3.msra.mxu1 %v2207_v52 }
 0x9d7   : > { %3449 = vmatmul.mubr.msk.f32.vlgmr.msra.gmra.mxu1 %vm4847_vm7, %v4499_v62  ;;  %v2104_v17 = vadd.f32 %v2103_v54, %v4098_v50  ;;  %v2206_v30 = vmax.f32 %v2100_v20, 0.0  ;;  %vm4858_vm7 = vmmov %vm4857_vm6 }
 0x9d8   : > { %v2105_v63 = vpop.f32.mrf.mxu1  ;;  %3469 = vmatprep.mubr.msk.f32.mxu1 %vm4836_vm8, %v4304_v53  ;;  %vm4859_vm8 = vcmask 900096  }
 0x9d9   : > { %v2106_v14 = vadd.f32 %v2105_v63, %v4098_v50  ;;  %v2208_v28 = vmax.f32 %v2104_v17, 0.0 }
 0x9da   : > { %v2109_v57 = vpop.f32.mrf.mxu1 }
 0x9db   : > { %v2110_v13 = vadd.f32 %v2109_v57, %v4095_v46  ;;  %v2209_v26 = vmax.f32 %v2106_v14, 0.0 }
 0x9dc   : > { %v2111_v1 = vpop.f32.mrf.mxu1 }
 0x9dd   : > { %v2112_v9 = vadd.f32 %v2111_v1, %v4095_v46  ;;  %v2211_v25 = vmax.f32 %v2110_v13, 0.0 }
 0x9de   : > { %v2115_v6 = vpop.f32.mrf.mxu1 }
 0x9df   : > { %v2116_v58 = vadd.f32 %v2115_v6, %v4093_v44  ;;  %v2212_v22 = vmax.f32 %v2112_v9, 0.0 }
 0x9e0   : > { %v2117_v8 = vpop.f32.mrf.mxu1 }
 0x9e1   : > { %v2118_v11 = vadd.f32 %v2117_v8, %v4093_v44  ;;  %v2214_v19 = vmax.f32 %v2116_v58, 0.0 }
 0x9e3   : > { %v2215_v16 = vmax.f32 %v2118_v11, 0.0 }
 0x9e5   : > { %2241 = vmatprep.subr.mxu0 %v2215_v16 }
 0x9e6   : > { %2242 = vmatpush1.msra.mxu0 %v2214_v19 }
 0x9e7   : > { %2243 = vmatprep.subr.mxu0 %v2212_v22 }
 0x9e8   : > { %2244 = vmatpush1.msra.mxu0 %v2211_v25 }
 0x9e9   : > { %2245 = vmatprep.subr.mxu0 %v2209_v26 }
 0x9ea   : > { %2246 = vmatpush1.msra.mxu0 %v2208_v28 }
 0x9eb   : > { %2247 = vmatprep.subr.mxu0 %v2206_v30 }
 0x9ec   : > { %2248 = vmatpush1.msra.mxu0 %v2205_v34 }
 0x9ed   : > { %3177 = vmatmul.mubr.msk.f32.vlgmr.msra.gmra.mxu0 %vm4848_vm10, %v4499_v62  ;;  %vm4860_vm10 = vmmov %vm4859_vm8 }
 0x9ee   : > { %2542 = vmatprep.mubr.f32.mxu0 %v3751_v5 }
 0xa97   : > { %v2354_v35 = vpop.f32.mrf.mxu1 }
 0xa98   : > { %v2355_v38 = vadd.f32 %v2354_v35, %v4137_v15 }
 0xa99   : > { %v3450_v37 = vpop.f32.mrf.mxu1 }
 0xaad   : > { %v2283_v10 = vpop.f32.mrf.mxu0 }
 0xaae   : > { %v2284_v39 = vadd.f32 %v2283_v10, %v4137_v15 }
 0xaaf   : > { %v2285_v59 = vpop.f32.mrf.mxu0 }
 0xab0   : > { %3597 = vtanh.f32 %v2284_v39  ;;  %v2286_v40 = vadd.f32 %v2285_v59, %v4137_v15 }
 0xab1   : > { %3599 = vtanh.f32 %v2355_v38 }
 0xab2   : > { %3601 = vtanh.f32 %v2286_v40 }
 0xabd   : > { %v3598_v45 = vpop.eup %3597 }
 0xabe   : > { %v3600_v2 = vpop.eup %3599  ;;  %v2361_v47 = vmul.f32 %v3598_v45, %v4143_v29 }
 0xabf   : > { %v3602_v48 = vpop.eup %3601  ;;  %v2363_v4 = vmul.f32 %v3600_v2, %v4150_v36 }
 0xac0   : > { %2367 = vrot.lane.b32.xlu0 %v2361_v47, %s3755_s8  ;;  %v2362_v33 = vmul.f32 %v3602_v48, %v4146_v31 }
 0xac2   : > { %2369 = vrot.lane.b32.xlu1 %v2362_v33, %s3755_s8 }
 0xac4   : > { %2371 = vrot.lane.b32.xlu0 %v2363_v4, %s3755_s8 }
 0xb32   : > { %v2368_v49 = vpop.permute.xlu0 %2367 }
 0xb33   : > { %v2378_v51 = vadd.f32 %v2368_v49, %v4336_v27 }
 0xb34   : > { %v2370_v52 = vpop.permute.xlu1 %2369 }
 0xb35   : > { %2381 = vst.msk [vmem:[%s3900_s21] sm:$0xff] %vm1113_vm1, %v2378_v51  ;;  %v2373_v27 = vsel %vm1104_vm2, %v2368_v49, %v2370_v52 }
 0xb36   : > { %v2372_v56 = vpop.permute.xlu0 %2371  ;;  %v4556_v1 = vadd.f32 %v2373_v27, %v4359_v0 }
 0xb37   : > { %v2374_v54 = vsel %vm1104_vm2, %v2370_v52, %v2372_v56 }
 0xb38   : > { %v2380_v63 = vadd.f32 %v2374_v54, %v4352_v3 }
 0xb3a   : > { %2383 = vst.msk [vmem:[%s3900_s21 + $0x10] sm:$0xff] %vm1116_vm3, %v2380_v63 }
 0xb3c   : > { %v4533_v57 = vld [vmem:[%s3900_s21] sm:$0xff] }
 0xb3d   : > { %2456 = vrot.lane.b32.xlu0 %v4533_v57, %s3745_s22  ;;  %2467 = vrot.lane.b32.xlu1 %v4533_v57, %s3744_s20 }
 0xb41   : > { %2434 = vrot.lane.b32.xlu0 %v4533_v57, %s3747_s29  ;;  %2445 = vrot.lane.b32.xlu1 %v4533_v57, %s4777_s9  ;;  %v4549_v3 = vld [vmem:[%s3900_s21 + $0x10] sm:$0xff] }
 0xb45   : > { %2412 = vrot.lane.b32.xlu0 %v4533_v57, %s4778_s23  ;;  %2423 = vrot.lane.b32.xlu1 %v4533_v57, %s4779_s15 }
 0xb49   : > { %2401 = vrot.lane.b32.xlu1 %v4533_v57, %s4780_s16  ;;  %2471 = vrot.lane.b32.xlu0 %v4549_v3, %s3744_s20 }
 0xb4d   : > { %2469 = vrot.lane.b32.xlu1 %v4556_v1, %s3744_s20  ;;  %2458 = vrot.lane.b32.xlu0 %v4556_v1, %s3745_s22  ;;  %s3508_s20 = smul.u32 384, %s3818_s28  ;;  %s4882_s28 = sand.u32 1, %s3730_s25  }
 0xb51   : > { %2460 = vrot.lane.b32.xlu1 %v4549_v3, %s3745_s22  ;;  %2449 = vrot.lane.b32.xlu0 %v4549_v3, %s4777_s9  ;;  %s3032_s22 = sshll.u32 %s3900_s21, 4  ;;  %s3033_s22 = int_to_ptr.vmem [resolvable:$true] %s3032_s22 }
 0xb55   : > { %2447 = vrot.lane.b32.xlu1 %v4556_v1, %s4777_s9  ;;  %2436 = vrot.lane.b32.xlu0 %v4556_v1, %s3747_s29  ;;  %s3030_s9 = scalar_lea.hbm %s4744_s7, %s3508_s20 }
 0xb59   : > { %2438 = vrot.lane.b32.xlu1 %v4549_v3, %s3747_s29  ;;  %2427 = vrot.lane.b32.xlu0 %v4549_v3, %s4779_s15 }
 0xb5d   : > { %2425 = vrot.lane.b32.xlu1 %v4556_v1, %s4779_s15  ;;  %2414 = vrot.lane.b32.xlu0 %v4556_v1, %s4778_s23  ;;  %s3670_s15 = scalar_lea.vmem %s3033_s22, 384 }
 0xb5e   : > { %p3671_p10 = scmp.ne.s32.totalorder %s3033_s22, %s3670_s15 }
 0xb60   : > { %p3672_p12 = pnand %p3671_p10, %p3835_p5 }
 0xb61   : > { %2416 = vrot.lane.b32.xlu1 %v4549_v3, %s4778_s23  ;;  %2405 = vrot.lane.b32.xlu0 %v4549_v3, %s4780_s16  ;;  %s3018_s23 = scalar_lea.sflag [#allocation4], %s4882_s28 }
 0xb62   : > { %p3673_p8 = pneg %p3672_p12 }
 0xb65   : > { %2403 = vrot.lane.b32.xlu1 %v4556_v1, %s4780_s16  ;;  %2392 = vrot.lane.b32.xlu0 %v4556_v1, %s4781_s17  ;;  %s3756_s16 = smov [#allocation7]  }
 0xb69   : > { %2394 = vrot.lane.b32.xlu1 %v4549_v3, %s4781_s17  ;;  %2390 = vrot.lane.b32.xlu0 %v4533_v57, %s4781_s17  ;;  %s3674_s17 = sshll.u32 %s3756_s16, 4  ;;  %s3675_s17 = int_to_ptr.vmem [resolvable:$false] %s3674_s17 }
 0xb6a   : > { %s3676_s18 = scalar_lea.vmem %s3675_s17, 768  ;;  %p3677_p11 = scmp.lt.s32.totalorder %s3033_s22, %s3675_s17 }
 0xb6b   : > { %p3678_p0 = scmp.lt.s32.totalorder %s3676_s18, %s3670_s15 }
 0xb6d   : > { %p3679_p1 = por %p3678_p0, %p3677_p11 }
 0xb6f   : > { %p3680_p3 = pnand %p3679_p1, %p3673_p8 }
 0xbaf   : > { %v2468_v0 = vpop.permute.xlu1 %2467  ;;  %v2457_v6 = vpop.permute.xlu0 %2456 }
 0xbb3   : > { %v2446_v58 = vpop.permute.xlu1 %2445  ;;  %v2435_v8 = vpop.permute.xlu0 %2434 }
 0xbb7   : > { %v2424_v9 = vpop.permute.xlu1 %2423  ;;  %v2413_v11 = vpop.permute.xlu0 %2412 }
 0xbbb   : > { %v2402_v13 = vpop.permute.xlu1 %2401  ;;  %v2472_v14 = vpop.permute.xlu0 %2471 }
 0xbbc   : > { %3451 = vmatprep.subr.mxu1 %v2472_v14 }
 0xbbd   : > { %3452 = vmatpush3.msra.mxu1 %v2472_v14 }
 0xbbf   : > { %v2470_v16 = vpop.permute.xlu1 %2469  ;;  %v2459_v17 = vpop.permute.xlu0 %2458 }
 0xbc0   : > { %v2473_v19 = vsel %vm4849_vm11, %v2468_v0, %v2470_v16  ;;  %v2474_v20 = vsel %vm4850_vm14, %v2470_v16, %v2472_v14  ;;  %v2462_v26 = vsel %vm4852_vm0, %v2457_v6, %v2459_v17  ;;  %vm4861_vm11 = vcmask 1031168  }
 0xbc1   : > { %2492 = vmatprep.subr.mxu0 %v2474_v20  ;;  %vm4862_vm14 = vmmov %vm4861_vm11 }
 0xbc2   : > { %2493 = vmatpush1.msra.mxu0 %v2473_v19 }
 0xbc3   : > { %v2461_v22 = vpop.permute.xlu1 %2460  ;;  %v2450_v23 = vpop.permute.xlu0 %2449 }
 0xbc4   : > { %3453 = vmatprep.subr.mxu1 %v2461_v22  ;;  %v2463_v25 = vsel %vm4851_vm15, %v2459_v17, %v2461_v22  ;;  %vm4863_vm15 = vcmask 1039360  }
 0xbc5   : > { %2494 = vmatprep.subr.mxu0 %v2463_v25  ;;  %3454 = vmatpush3.msra.mxu1 %v2461_v22  ;;  %vm4864_vm0 = vmmov %vm4863_vm15 }
 0xbc6   : > { %2495 = vmatpush1.msra.mxu0 %v2462_v26  ;;  %3455 = vmatprep.subr.mxu1 %v2450_v23 }
 0xbc7   : > { %v2448_v28 = vpop.permute.xlu1 %2447  ;;  %3456 = vmatpush3.msra.mxu1 %v2450_v23  ;;  %v2437_v30 = vpop.permute.xlu0 %2436 }
 0xbc8   : > { %v2451_v34 = vsel %vm4853_vm12, %v2446_v58, %v2448_v28  ;;  %v2452_v35 = vsel %vm4854_vm13, %v2448_v28, %v2450_v23  ;;  %v2440_v39 = vsel %vm4856_vm5, %v2435_v8, %v2437_v30  ;;  %vm4865_vm12 = vcmask 588800  }
 0xbc9   : > { %2496 = vmatprep.subr.mxu0 %v2452_v35  ;;  %vm4866_vm13 = vmmov %vm4865_vm12 }
 0xbca   : > { %2497 = vmatpush1.msra.mxu0 %v2451_v34 }
 0xbcb   : > { %v2439_v37 = vpop.permute.xlu1 %2438  ;;  %v2428_v38 = vpop.permute.xlu0 %2427 }
 0xbcc   : > { %3457 = vmatprep.subr.mxu1 %v2439_v37  ;;  %v2441_v10 = vsel %vm4855_vm4, %v2437_v30, %v2439_v37  ;;  %vm4867_vm4 = vmmov %vm4865_vm12 }
 0xbcd   : > { %2498 = vmatprep.subr.mxu0 %v2441_v10  ;;  %3458 = vmatpush3.msra.mxu1 %v2439_v37  ;;  %vm4868_vm5 = vmmov %vm4867_vm4 }
 0xbce   : > { %2499 = vmatpush1.msra.mxu0 %v2440_v39  ;;  %3459 = vmatprep.subr.mxu1 %v2428_v38 }
 0xbcf   : > { %v2426_v59 = vpop.permute.xlu1 %2425  ;;  %3460 = vmatpush3.msra.mxu1 %v2428_v38  ;;  %v2415_v40 = vpop.permute.xlu0 %2414 }
 0xbd0   : > { %v2429_v45 = vsel %vm4857_vm6, %v2424_v9, %v2426_v59  ;;  %v2430_v2 = vsel %vm4858_vm7, %v2426_v59, %v2428_v38  ;;  %v2418_v4 = vsel %vm4860_vm10, %v2413_v11, %v2415_v40  ;;  %vm4869_vm6 = vmmov %vm4867_vm4  ;;  %vm4872_vm10 = vcmask 261120  }
 0xbd1   : > { %2500 = vmatprep.subr.mxu0 %v2430_v2  ;;  %vm4870_vm7 = vmmov %vm4867_vm4 }
 0xbd2   : > { %2501 = vmatpush1.msra.mxu0 %v2429_v45 }
 0xbd3   : > { %v2417_v47 = vpop.permute.xlu1 %2416  ;;  %v2406_v48 = vpop.permute.xlu0 %2405 }
 0xbd4   : > { %3461 = vmatprep.subr.mxu1 %v2417_v47  ;;  %v2419_v33 = vsel %vm4859_vm8, %v2415_v40, %v2417_v47  ;;  %vm4871_vm8 = vmmov %vm4867_vm4 }
 0xbd5   : > { %2502 = vmatprep.subr.mxu0 %v2419_v33  ;;  %3462 = vmatpush3.msra.mxu1 %v2417_v47 }
 0xbd6   : > { %2503 = vmatpush1.msra.mxu0 %v2418_v4  ;;  %3463 = vmatprep.subr.mxu1 %v2406_v48 }
 0xbd7   : > { %v2404_v49 = vpop.permute.xlu1 %2403  ;;  %3464 = vmatpush3.msra.mxu1 %v2406_v48  ;;  %v2393_v51 = vpop.permute.xlu0 %2392 }
 0xbd8   : > { %v2407_v52 = vsel %vm4861_vm11, %v2402_v13, %v2404_v49  ;;  %v2408_v56 = vsel %vm4862_vm14, %v2404_v49, %v2406_v48  ;;  %vm4873_vm11 = vmmov %vm4872_vm10 }
 0xbd9   : > { %2504 = vmatprep.subr.mxu0 %v2408_v56  ;;  %vm4874_vm14 = vmmov %vm4872_vm10 }
 0xbda   : > { %2505 = vmatpush1.msra.mxu0 %v2407_v52 }
 0xbdb   : > { %v2395_v54 = vpop.permute.xlu1 %2394  ;;  %v2391_v63 = vpop.permute.xlu0 %2390 }
 0xbdc   : > { %v2396_v27 = vsel %vm4863_vm15, %v2391_v63, %v2393_v51  ;;  %3465 = vmatprep.subr.mxu1 %v2395_v54  ;;  %v2397_v0 = vsel %vm4864_vm0, %v2393_v51, %v2395_v54  ;;  %vm4875_vm15 = vmmov %vm4872_vm10 }
 0xbdd   : > { %2506 = vmatprep.subr.mxu0 %v2397_v0  ;;  %3466 = vmatpush3.msra.mxu1 %v2395_v54  ;;  %vm4876_vm0 = vmmov %vm4872_vm10 }
 0xbde   : > { %2507 = vmatpush1.msra.mxu0 %v2396_v27  ;;  %3467 = vmatprep.subr.mxu1 %v4549_v3 }
 0xbdf   : > { %2508 = vmatprep.subr.mxu0 %v4556_v1  ;;  %3468 = vmatpush3.msra.mxu1 %v4549_v3 }
 0xbe0   : > { %2509 = vmatpush1.msra.mxu0 %v4533_v57  ;;  %3470 = vmatmul.mubr.msk.f32.vlgmr.msra.gmra.mxu1 %vm4865_vm12, %v4413_v41  ;;  %vm4877_vm12 = vmmov %vm4876_vm0 }
 0xbe1   : > { %3179 = vmatmul.mubr.msk.f32.vlgmr.msra.gmra.mxu0 %vm4866_vm13, %v4304_v53  ;;  %3472 = vmatprep.mubr.msk.f32.mxu1 %vm4867_vm4, %v4419_v42  ;;  %vm4878_vm13 = vmmov %vm4876_vm0 }
 0xbe2   : > { %2548 = vmatprep.mubr.f32.mxu0 %v3751_v5  ;;  %vm4879_vm4 = vmmov %vm4876_vm0 }
 0xbe4   : > { %3473 = vmatmul.mubr.msk.f32.gmra.mxu1 %vm4868_vm5, %v4424_v43  ;;  %vm4881_vm5 = vmmov %vm4876_vm0 }
 0xbe5   : > { %3180 = vmatmul.mubr.msk.f32.gmra.mxu0 %vm4869_vm6, %v4413_v41  ;;  %2728 = vmatprep.mubr.f32.mxu1 %v3751_v5 }
 0xbe6   : > { %2554 = vmatprep.mubr.f32.mxu0 %v3751_v5 }
 0xbe9   : > { %3181 = vmatmul.mubr.msk.f32.gmra.mxu0 %vm4870_vm7, %v4419_v42 }
 0xbea   : > { %2560 = vmatprep.mubr.f32.mxu0 %v3751_v5 }
 0xbed   : > { %3182 = vmatmul.mubr.msk.f32.gmra.mxu0 %vm4871_vm8, %v4424_v43 }
 0xbee   : > { %3483 = vmatprep.mubr.msk.f32.mxu0 %vm4872_vm10, %v4440_v24 }
 0xca0   : > { %v3471_v53 = vpop.f32.mrf.mxu1 }
 0xca1   : > { %v2544_v6 = vpop.f32.mrf.mxu0  ;;  %v2639_v14 = vadd.f32 %v3471_v53, %v4041_v7 }
 0xca2   : > { %v2633_v58 = vpop.f32.mrf.mxu1 }
 0xca3   : > { %v2546_v8 = vpop.f32.mrf.mxu0  ;;  %v2634_v43 = vadd.f32 %v2633_v58, %v4045_v12  ;;  %v2657_v22 = vmax.f32 %v2639_v14, 0.0 }
 0xca4   : > { %v3474_v41 = vpop.f32.mrf.mxu1  ;;  %v2547_v40 = vadd.f32 %v2546_v8, %v4045_v12 }
 0xca5   : > { %v2649_v9 = vadd.f32 %v3474_v41, %v4039_v61  ;;  %v2550_v11 = vpop.f32.mrf.mxu0  ;;  %v2654_v25 = vmax.f32 %v2634_v43, 0.0 }
 0xca6   : > { %v2643_v13 = vpop.f32.mrf.mxu1  ;;  %v2551_v39 = vadd.f32 %v2550_v11, %v4041_v7  ;;  %v2653_v48 = vmax.f32 %v2547_v40, 0.0 }
 0xca7   : > { %v2663_v42 = vmax.f32 %v2649_v9, 0.0  ;;  %v2644_v16 = vadd.f32 %v2643_v13, %v4037_v60  ;;  %v2552_v17 = vpop.f32.mrf.mxu0 }
 0xca8   : > { %v2553_v38 = vadd.f32 %v2552_v17, %v4041_v7  ;;  %v2655_v47 = vmax.f32 %v2551_v39, 0.0 }
 0xca9   : > { %v2660_v19 = vmax.f32 %v2644_v16, 0.0  ;;  %v2556_v20 = vpop.f32.mrf.mxu0  ;;  %3475 = vmatprep.subr.mxu0 %v2663_v42 }
 0xcaa   : > { %3476 = vmatpush3.msra.mxu0 %v2663_v42  ;;  %v2557_v37 = vadd.f32 %v2556_v20, %v4037_v60 }
 0xcab   : > { %v2558_v23 = vpop.f32.mrf.mxu0  ;;  %3477 = vmatprep.subr.mxu0 %v2660_v19 }
 0xcac   : > { %3478 = vmatpush3.msra.mxu0 %v2660_v19  ;;  %v2559_v34 = vadd.f32 %v2558_v23, %v4037_v60  ;;  %v2658_v2 = vmax.f32 %v2557_v37, 0.0  ;;  %v2656_v60 = vmax.f32 %v2553_v38, 0.0 }
 0xcad   : > { %v2562_v26 = vpop.f32.mrf.mxu0  ;;  %3479 = vmatprep.subr.mxu0 %v2657_v22 }
 0xcae   : > { %3480 = vmatpush3.msra.mxu0 %v2657_v22  ;;  %v2563_v28 = vadd.f32 %v2562_v26, %v4039_v61  ;;  %v2659_v45 = vmax.f32 %v2559_v34, 0.0 }
 0xcaf   : > { %v2564_v30 = vpop.f32.mrf.mxu0  ;;  %3481 = vmatprep.subr.mxu0 %v2654_v25 }
 0xcb0   : > { %v2565_v35 = vadd.f32 %v2564_v30, %v4039_v61  ;;  %3482 = vmatpush3.msra.mxu0 %v2654_v25  ;;  %v2661_v59 = vmax.f32 %v2563_v28, 0.0  ;;  %v2545_v61 = vadd.f32 %v2544_v6, %v4045_v12 }
 0xcb1   : > { %3484 = vmatmul.mubr.msk.f32.vlgmr.msra.gmra.mxu0 %vm4873_vm11, %v4455_v18 }
 0xcb2   : > { %v2662_v10 = vmax.f32 %v2565_v35, 0.0  ;;  %3486 = vmatprep.mubr.msk.f32.mxu0 %vm4874_vm14, %v4463_v21  ;;  %v2652_v7 = vmax.f32 %v2545_v61, 0.0 }
 0xcb4   : > { %2688 = vmatprep.subr.mxu1 %v2662_v10 }
 0xcb5   : > { %2689 = vmatpush1.msra.mxu1 %v2661_v59  ;;  %3487 = vmatmul.mubr.msk.f32.gmra.mxu0 %vm4875_vm15, %v4473_v32 }
 0xcb6   : > { %2690 = vmatprep.subr.mxu1 %v2659_v45  ;;  %2914 = vmatprep.mubr.f32.mxu0 %v3751_v5 }
 0xcb7   : > { %2691 = vmatpush1.msra.mxu1 %v2658_v2 }
 0xcb8   : > { %2692 = vmatprep.subr.mxu1 %v2656_v60 }
 0xcb9   : > { %2693 = vmatpush1.msra.mxu1 %v2655_v47 }
 0xcba   : > { %2694 = vmatprep.subr.mxu1 %v2653_v48 }
 0xcbb   : > { %2695 = vmatpush1.msra.mxu1 %v2652_v7 }
 0xcbc   : > { %3187 = vmatmul.mubr.msk.f32.vlgmr.msra.gmra.mxu1 %vm4876_vm0, %v4440_v24  ;;  %3489 = vmatprep.subr.mxu1 %v3751_v5 }
 0xcbd   : > { %2734 = vmatprep.mubr.f32.mxu1 %v3751_v5 }
 0xcc0   : > { %3188 = vmatmul.mubr.msk.f32.gmra.mxu1 %vm4877_vm12, %v4455_v18 }
 0xcc1   : > { %2740 = vmatprep.mubr.f32.mxu1 %v3751_v5 }
 0xcc4   : > { %3189 = vmatmul.mubr.msk.f32.gmra.mxu1 %vm4878_vm13, %v4463_v21 }
 0xcc5   : > { %2746 = vmatprep.mubr.f32.mxu1 %v3751_v5 }
 0xcc8   : > { %3190 = vmatmul.mubr.msk.f32.gmra.mxu1 %vm4879_vm4, %v4473_v32 }
 0xcc9   : > { %3497 = vmatprep.mubr.msk.f32.mxu1 %vm4813_vm9, %v3751_v5  ;;  %vm4880_vm9 = vmmov %vm4876_vm0 }
 0xd71   : > { %v3485_v12 = vpop.f32.mrf.mxu0 }
 0xd72   : > { %v2825_v18 = vadd.f32 %v3485_v12, %v4098_v50 }
 0xd73   : > { %v2819_v24 = vpop.f32.mrf.mxu0 }
 0xd74   : > { %v2820_v21 = vadd.f32 %v2819_v24, %v4102_v55  ;;  %v2843_v32 = vmax.f32 %v2825_v18, 0.0 }
 0xd75   : > { %v3488_v33 = vpop.f32.mrf.mxu0 }
 0xd76   : > { %v2835_v4 = vadd.f32 %v3488_v33, %v4093_v44  ;;  %v2840_v63 = vmax.f32 %v2820_v21, 0.0 }
 0xd77   : > { %v2829_v49 = vpop.f32.mrf.mxu0 }
 0xd78   : > { %v2849_v51 = vmax.f32 %v2835_v4, 0.0  ;;  %v2830_v52 = vadd.f32 %v2829_v49, %v4095_v46 }
 0xd7a   : > { %v2846_v56 = vmax.f32 %v2830_v52, 0.0  ;;  %3490 = vmatpush3.msra.mxu1 %v2849_v51 }
 0xd7b   : > { %3491 = vmatprep.subr.mxu1 %v3751_v5 }
 0xd7c   : > { %v2730_v54 = vpop.f32.mrf.mxu1  ;;  %3492 = vmatpush3.msra.mxu1 %v2846_v56 }
 0xd7d   : > { %3493 = vmatprep.subr.mxu1 %v3751_v5  ;;  %v2731_v20 = vadd.f32 %v2730_v54, %v4102_v55 }
 0xd7e   : > { %v2732_v27 = vpop.f32.mrf.mxu1  ;;  %3494 = vmatpush3.msra.mxu1 %v2843_v32 }
 0xd7f   : > { %3495 = vmatprep.subr.mxu1 %v3751_v5  ;;  %v2733_v43 = vadd.f32 %v2732_v27, %v4102_v55 }
 0xd80   : > { %v2736_v0 = vpop.f32.mrf.mxu1  ;;  %3496 = vmatpush3.msra.mxu1 %v2840_v63 }
 0xd81   : > { %3498 = vmatmul.mubr.msk.f32.vlgmr.msra.gmra.mxu1 %vm4880_vm9, %v4499_v62  ;;  %v2737_v16 = vadd.f32 %v2736_v0, %v4098_v50 }
 0xd82   : > { %v2738_v53 = vpop.f32.mrf.mxu1 }
 0xd83   : > { %v2739_v5 = vadd.f32 %v2738_v53, %v4098_v50  ;;  %v2841_v25 = vmax.f32 %v2737_v16, 0.0 }
 0xd84   : > { %v2742_v6 = vpop.f32.mrf.mxu1 }
 0xd85   : > { %v2743_v14 = vadd.f32 %v2742_v6, %v4095_v46  ;;  %v2842_v23 = vmax.f32 %v2739_v5, 0.0 }
 0xd86   : > { %v2744_v58 = vpop.f32.mrf.mxu1 }
 0xd87   : > { %v2745_v11 = vadd.f32 %v2744_v58, %v4095_v46  ;;  %v2844_v22 = vmax.f32 %v2743_v14, 0.0  ;;  %v2838_v46 = vmax.f32 %v2731_v20, 0.0 }
 0xd88   : > { %v2748_v8 = vpop.f32.mrf.mxu1 }
 0xd89   : > { %v2749_v41 = vadd.f32 %v2748_v8, %v4093_v44  ;;  %v2845_v19 = vmax.f32 %v2745_v11, 0.0 }
 0xd8a   : > { %v2750_v9 = vpop.f32.mrf.mxu1 }
 0xd8b   : > { %v2751_v13 = vadd.f32 %v2750_v9, %v4093_v44  ;;  %v2847_v17 = vmax.f32 %v2749_v41, 0.0  ;;  %v2839_v44 = vmax.f32 %v2733_v43, 0.0 }
 0xd8d   : > { %v2848_v42 = vmax.f32 %v2751_v13, 0.0 }
 0xd8f   : > { %2874 = vmatprep.subr.mxu0 %v2848_v42 }
 0xd90   : > { %2875 = vmatpush1.msra.mxu0 %v2847_v17 }
 0xd91   : > { %2876 = vmatprep.subr.mxu0 %v2845_v19 }
 0xd92   : > { %2877 = vmatpush1.msra.mxu0 %v2844_v22 }
 0xd93   : > { %2878 = vmatprep.subr.mxu0 %v2842_v23 }
 0xd94   : > { %2879 = vmatpush1.msra.mxu0 %v2841_v25 }
 0xd95   : > { %2880 = vmatprep.subr.mxu0 %v2839_v44 }
 0xd96   : > { %2881 = vmatpush1.msra.mxu0 %v2838_v46 }
 0xd97   : > { %3195 = vmatmul.mubr.msk.f32.vlgmr.msra.gmra.mxu0 %vm4881_vm5, %v4499_v62 }
 0xe41   : > { %v2987_v50 = vpop.f32.mrf.mxu1 }
 0xe42   : > { %v2988_v28 = vadd.f32 %v2987_v50, %v4137_v15 }
 0xe43   : > { %v3499_v26 = vpop.f32.mrf.mxu1 }
 0xe57   : > { %v2916_v55 = vpop.f32.mrf.mxu0 }
 0xe58   : > { %v2917_v30 = vadd.f32 %v2916_v55, %v4137_v15 }
 0xe59   : > { %v2918_v34 = vpop.f32.mrf.mxu0 }
 0xe5a   : > { %3603 = vtanh.f32 %v2917_v30  ;;  %v2919_v35 = vadd.f32 %v2918_v34, %v4137_v15 }
 0xe5b   : > { %3605 = vtanh.f32 %v2988_v28 }
 0xe5c   : > { %3607 = vtanh.f32 %v2919_v35 }
 0xe67   : > { %v3604_v37 = vpop.eup %3603 }
 0xe68   : > { %v3606_v38 = vpop.eup %3605  ;;  %v2994_v62 = vmul.f32 %v3604_v37, %v4143_v29 }
 0xe69   : > { %v3608_v10 = vpop.eup %3607  ;;  %v2996_v59 = vmul.f32 %v3606_v38, %v4150_v36 }
 0xe6a   : > { %3000 = vrot.lane.b32.xlu1 %v2994_v62, %s3755_s8  ;;  %v2995_v39 = vmul.f32 %v3608_v10, %v4146_v31 }
 0xe6c   : > { %3002 = vrot.lane.b32.xlu0 %v2995_v39, %s3755_s8 }
 0xe6e   : > { %3004 = vrot.lane.b32.xlu1 %v2996_v59, %s3755_s8 }
 0xedc   : > { %v3001_v15 = vpop.permute.xlu1 %3000 }
 0xedd   : > { %v3011_v40 = vadd.f32 %v3001_v15, %v4533_v57 }
 0xede   : > { %v3003_v45 = vpop.permute.xlu0 %3002 }
 0xedf   : > { %3014 = vst.msk [vmem:[%s3900_s21] sm:$0xff] %vm1113_vm1, %v3011_v40  ;;  %v3006_v29 = vsel %vm1104_vm2, %v3001_v15, %v3003_v45 }
 0xee0   : > { %v3012_v31 = vadd.f32 %v3006_v29, %v4556_v1  ;;  %v3005_v61 = vpop.permute.xlu1 %3004 }
 0xee1   : > { %v3007_v36 = vsel %vm1104_vm2, %v3003_v45, %v3005_v61 }
 0xee2   : > { %3015 = vst [vmem:[%s3900_s21 + $0x8] sm:$0xff] %v3012_v31  ;;  %v3013_v2 = vadd.f32 %v3007_v36, %v4549_v3 }
 0xee4   : > { %3016 = vst.msk [vmem:[%s3900_s21 + $0x10] sm:$0xff] %vm1116_vm3, %v3013_v2 }
 0xee5   : > { %3683 = shalt.err (!%p3680_p3)
}
 0xee6   : > { %s3684_s19 = scalar_lea.hbm %s3030_s9, 384  ;;  %s3688_s13 = scalar_lea.hbm %s4744_s7, 768 }
 0xee7   : > { %p3685_p2 = scmp.ne.s32.totalorder %s3030_s9, %s3684_s19  ;;  %p3689_p7 = scmp.lt.s32.totalorder %s3030_s9, %s4744_s7 }
 0xee8   : > { %p3690_p6 = scmp.lt.s32.totalorder %s3688_s13, %s3684_s19 }
 0xee9   : > { %p3686_p4 = pnand %p3685_p2, %p3835_p5 }
 0xeea   : > { %p3691_p9 = por %p3690_p6, %p3689_p7 }
 0xeeb   : > { %p3687_p13 = pneg %p3686_p4 }
 0xeed   : > { %p3692_p10 = pnand %p3691_p9, %p3687_p13 }
 0xeef   : > { %3695 = shalt.err (!%p3692_p10)
}
 0xef0   : > { %3517 = dma.vmem_to_hbm [thread:$0]  (%p3835_p5), %s3033_s22, 384, %s3030_s9, %s3018_s23  }
 0xef1 PF: > { %p3534_p12 = scmp.ge.s32.totalorder %s3738_s27, 2  ;;  %s3044_s8 = sand.u32 1, %s3726_s24  }
 0xef2   : > { %p4883_p8 = scmp.ne.s32.totalorder %s4770_s12, 0  ;;  %s3045_s28 = scalar_lea.sflag [#allocation4], %s3044_s8 }
 0xef4   : > { %p3527_p11 = pnand %p3534_p12, %p4883_p8 }
 0xef6   : > { %p3528_p0 = pneg %p3527_p11 }
 0xef8   : > { %3721 = dma.done.wait (%p3528_p0), %s3045_s28, 384  }
 0xef9   : > { %3723 = vsyncadd (%p3528_p0), %s3045_s28, 4294966912  ;;  %p19_p1 = scmp.ge.s32.totalorder %s3822_s30, 4   ;;  %s4884_s24 = smov %s3730_s25 }
 0xefa   : > { %s4885_s25 = smov %s3734_s26  ;;  %s4886_s26 = smov %s3833_s10 }
 0xefb   : > { %s4887_s27 = smov %s3822_s30  ;;  %21 = sbr.rel (!%p19_p1) target bundleno = 5 (0x5), region = 92 }
 0xf00   :  { %3050 = vsyncpa [#allocation3], 1 }
 0xf01   :  { %3052 = vsyncpa [#allocation3 + $0x1], 1 }
 0xf02   :  { %3053 = vsyncpa [#allocation6], 1 }
 0xf03   :  { %3054 = vsyncpa [#allocation4], 1 }
 0xf04   :  { %3056 = vsyncpa [#allocation4 + $0x1], 1 }

</bundles_post_ra>
